<compile_context>
chip_gen: v6e
topology: v6e:2x2x1
jax: 0.10.0
libtpu: 0.0.40
codegen_flags: <defaults>
</compile_context>

<pallas_src>
import functools

import jax
import jax.numpy as jnp
import numpy as np
from jax.experimental import pallas as pl
from jax.experimental.pallas import tpu as pltpu


# ----------------------------------------------------------------------------
# Host-side weight restructuring (setup time, numpy).
# ----------------------------------------------------------------------------
def fold_conv_after_ps2(w):
    """Sub-pixel convolution identity.

    For a 3x3 SAME conv with HWIO weights `w` (Ci -> Co) applied AFTER a
    PixelShuffle(2), returns `wf` (4*Ci -> 4*Co) such that
        conv(PS2(z); w) == PS2(conv(z; wf)),
    with folded channel ordering 4*c + (i*2 + j)  (PyTorch PixelShuffle order).
    """
    kh, kw, ci, co = w.shape
    wf = np.zeros((3, 3, 4 * ci, 4 * co), np.float32)
    for i in (0, 1):
        for j in (0, 1):
            for dp in (-1, 0, 1):
                for dq in (-1, 0, 1):
                    a, i2 = divmod(i + dp, 2)
                    b, j2 = divmod(j + dq, 2)
                    wf[a + 1, b + 1, (i2 * 2 + j2)::4, (i * 2 + j)::4] = w[dp + 1, dq + 1]
    return wf


def make_row_toeplitz(w, ws):
    """Row-form Toeplitz weights for a 3x3 SAME conv on rows of width `ws`.

    w: (3, 3, Cin, Cout) HWIO.  Returns T: (3, ws*Cin, ws*Cout) so that, with
    xv the row-flattened input (lane index wi*Cin + ci) padded by one zero row
    on top/bottom,   out_row[h] = sum_dy xv[h + dy] @ T[dy]
    equals the SAME conv output row h (lane index wo*Cout + co).
    """
    kh, kw, cin, cout = w.shape
    T = np.zeros((kh, ws * cin, ws * cout), np.float32)
    for dy in range(kh):
        for wo in range(ws):
            for dx in range(kw):
                wi = wo + dx - 1
                if 0 <= wi < ws:
                    T[dy, wi * cin:(wi + 1) * cin, wo * cout:(wo + 1) * cout] = w[dy, dx]
    return T


# ----------------------------------------------------------------------------
# Fused Pallas kernel: nb images per grid step, everything stays in VMEM.
# ----------------------------------------------------------------------------
def _fused_duc_kernel(x_ref, t1_ref, t2_ref, s1_ref, b2_ref, o_ref, ypad_ref,
                      *, nb, h):
    """Per grid step:

    x_ref   : (1, nb*(h+2), K1) bf16  pre-padded, batch-stacked input rows
    t1_ref  : (3, K1, N1)       bf16  row-Toeplitz of folded conv1 (BN scale folded)
    t2_ref  : (3, N1, N2)       bf16  row-Toeplitz of double-folded conv2
    s1_ref  : (1, N1)           f32   BN shift row  (stage-1 accumulator init)
    b2_ref  : (1, N2)           f32   conv2 bias row (stage-2 accumulator init)
    o_ref   : (1, nb*h, N2)     f32   lane-dense output rows
    ypad_ref: (nb*(h+2), N1)    f32   stage-1 result in stacked-padded layout
                                      (kept f32 so the +1-row shifted store
                                       stays on the plain 32-bit store path;
                                       operands are cast to bf16 at the dot)
    """
    slab = h + 2                 # padded rows per image
    mp = nb * slab               # stacked padded rows per step
    mv = mp - 2                  # rows per stacked dot (incl. junk seam rows)
    n1 = t1_ref.shape[2]
    n2 = t2_ref.shape[2]

    # ---- stage 1: conv1 (+ first pixel-shuffle + BN scale folded into T1) ----
    x = x_ref[0]                                           # (mp, K1) bf16
    acc1 = jnp.broadcast_to(s1_ref[...], (mv, n1))         # BN shift as init
    for dy in range(3):                                    # static unroll
        acc1 = acc1 + jnp.dot(x[dy:dy + mv, :], t1_ref[dy],
                              preferred_element_type=jnp.float32)
    y1 = jnp.maximum(acc1, 0.0)                            # ReLU, (mv, N1) f32

    # Scatter into the stacked-padded layout: valid rows land one row down;
    # the per-image halo rows (read as zero padding by stage 2) are re-zeroed
    # every step (only 2 single-row stores per image -- safe under megacore
    # "parallel" splitting, unlike a program_id==0 one-shot init).
    ypad_ref[1:mp - 1, :] = y1
    zrow = jnp.zeros((1, n1), ypad_ref.dtype)
    for b in range(nb):
        ypad_ref[b * slab:b * slab + 1, :] = zrow                  # top halo
        ypad_ref[b * slab + h + 1:b * slab + h + 2, :] = zrow      # bottom halo

    # ---- stage 2: conv2 (+ both pixel shuffles folded into T2) ---------------
    yp = ypad_ref[...]                                     # (mp, N1) f32
    acc2 = jnp.broadcast_to(b2_ref[...], (mv, n2))         # conv bias as init
    for dy in range(3):
        acc2 = acc2 + jnp.dot(yp[dy:dy + mv, :].astype(jnp.bfloat16), t2_ref[dy],
                              preferred_element_type=jnp.float32)

    # Drop the per-image seam rows and write lane-dense output rows.
    # TODO(synk): for large nb, tile the dots/accumulators over ~64-row chunks
    #             so they stay within the 64-vreg file.
    if nb == 1:
        out_val = acc2[0:h, :]
    else:
        out_val = jnp.concatenate(
            [acc2[b * slab:b * slab + h, :] for b in range(nb)], axis=0)
    o_ref[...] = out_val.reshape(1, nb * h, n2).astype(o_ref.dtype)


# ----------------------------------------------------------------------------
# Glue: PixelShuffle in NHWC (pure data movement, fused by XLA with the
# boundary transposes).  NCHW semantics:
#   out[n, c, h*r+i, w*r+j] = in[n, c*r*r + i*r + j, h, w]
# ----------------------------------------------------------------------------
def pixel_shuffle_nhwc(x, r):
    n, h, w, c = x.shape
    co = c // (r * r)
    x = x.reshape(n, h, w, co, r, r)
    x = jnp.transpose(x, (0, 1, 4, 2, 5, 3))
    return x.reshape(n, h * r, w * r, co)


# ----------------------------------------------------------------------------
# Parameter construction (deterministic, synthetic) + kernel-side constants.
# ----------------------------------------------------------------------------
def make_params(key, in_channels, out_channels, height, width):
    c1_in = in_channels // 4        # DUCs[1] = duc1.conv input channels
    c1_out = in_channels // 2       # DUCs[0] = duc1.conv output channels
    c2_in = c1_out // 4             # conv_out input channels
    k1, k2, k3, k4, k5, k6 = jax.random.split(key, 6)

    # duc1.conv: Conv2d(Cin/4 -> Cin/2, 3x3, bias=False), HWIO layout.
    w1 = 0.1 * jax.random.normal(k1, (3, 3, c1_in, c1_out), jnp.float32)

    # duc1.bn evaluated in inference mode (running stats).
    # TODO(synk): training-mode BN (batch statistics) not implemented; the
    #             inference-mode affine is folded into the conv weights.
    gamma = 1.0 + 0.1 * jax.random.normal(k2, (c1_out,), jnp.float32)
    beta = 0.05 * jax.random.normal(k3, (c1_out,), jnp.float32)
    running_mean = 0.1 * jax.random.normal(k4, (c1_out,), jnp.float32)
    running_var = jnp.abs(jax.random.normal(k5, (c1_out,), jnp.float32)) + 0.5
    eps = 1e-5
    bn_scale = gamma / jnp.sqrt(running_var + eps)
    bn_shift = beta - running_mean * bn_scale

    # conv_out: Conv2d(Cin/8 -> out_channels, 3x3, bias=True), HWIO layout.
    w2 = 0.1 * jax.random.normal(k6, (3, 3, c2_in, out_channels), jnp.float32)
    b2 = 0.01 * jnp.arange(out_channels, dtype=jnp.float32)

    # ------ derived kernel-side constants (host numpy, one-time setup) ------
    # Fold suffle1 into conv1 (Cin -> 4*c1_out on the HxW grid), fold the BN
    # scale into its output channels, and fold BOTH shuffles into conv2
    # (4*c1_out -> 16*out on the HxW grid).  Both convs then become 3
    # lane-dense row-Toeplitz matmuls each.
    w1f = fold_conv_after_ps2(np.asarray(w1))                           # (3,3,Cin,4*c1_out)
    w1f = w1f * np.repeat(np.asarray(bn_scale), 4)[None, None, None, :]
    w2f = fold_conv_after_ps2(fold_conv_after_ps2(np.asarray(w2)))      # (3,3,4*c1_out,16*out)

    t1 = make_row_toeplitz(w1f, width)              # (3, W*Cin,       W*4*c1_out)
    t2 = make_row_toeplitz(w2f, width)              # (3, W*4*c1_out,  W*16*out)
    shift1_row = np.tile(np.repeat(np.asarray(bn_shift), 4), width)[None, :]
    bias2_row = np.tile(np.repeat(np.asarray(b2), 16), width)[None, :]

    return {
        # raw params (used by the reference, kept for the parity check)
        "w1": w1, "bn_scale": bn_scale, "bn_shift": bn_shift, "w2": w2, "b2": b2,
        # fused-kernel constants (bf16 MXU operands, f32 accumulator inits)
        "t1": jnp.asarray(t1, dtype=jnp.bfloat16),
        "t2": jnp.asarray(t2, dtype=jnp.bfloat16),
        "shift1_row": jnp.asarray(shift1_row, dtype=jnp.float32),
        "bias2_row": jnp.asarray(bias2_row, dtype=jnp.float32),
    }


# ----------------------------------------------------------------------------
# VMEM budget from actual buffer sizes.
# ----------------------------------------------------------------------------
def _buf_bytes(shape, dtype):
    s = list(shape)
    s[-1] = -(-s[-1] // 128) * 128
    if len(s) >= 2:
        s[-2] = -(-s[-2] // 8) * 8
    return int(np.prod(s)) * np.dtype(dtype).itemsize


# ----------------------------------------------------------------------------
# Full forward: one fused Pallas kernel, one format copy on each side.
# ----------------------------------------------------------------------------
@jax.jit
def topdown_1duc_forward(x_nchw, params):
    n, cin, h, w = x_nchw.shape
    t1, t2 = params["t1"], params["t2"]
    s1, b2r = params["shift1_row"], params["bias2_row"]
    k1, n1 = t1.shape[1], t1.shape[2]       # W*Cin, W*2*Cin
    n2 = t2.shape[2]                        # W*16*out

    # Two grid steps keep both v7x TensorCores busy; the per-step batch slice
    # folds into the matmul M dimension (amortizes the fixed per-step cost on
    # single-core v5e/v6e).
    steps = 2 if (n % 2 == 0 and n >= 2) else 1
    nb = n // steps
    slab = h + 2
    mp = nb * slab

    # Input formatting: NCHW -> row-flattened NHWC -> one zero halo row per
    # image side -> bf16 -> nb images stacked per grid step.  One fused XLA
    # copy; no input-side pixel shuffle (it is folded into T1).
    xr = jnp.transpose(x_nchw, (0, 2, 3, 1)).reshape(n, h, w * cin)
    xr = jnp.pad(xr, ((0, 0), (1, 1), (0, 0))).astype(jnp.bfloat16)
    xr = xr.reshape(steps, mp, w * cin)

    # VMEM budget (x2 for the default double buffering of pipelined operands).
    est = (2 * _buf_bytes((mp, k1), jnp.bfloat16)
           + 2 * _buf_bytes((3, k1, n1), jnp.bfloat16)
           + 2 * _buf_bytes((3, n1, n2), jnp.bfloat16)
           + 2 * _buf_bytes((1, n1), jnp.float32)
           + 2 * _buf_bytes((1, n2), jnp.float32)
           + 2 * _buf_bytes((nb * h, n2), jnp.float32)
           + _buf_bytes((mp, n1), jnp.float32))
    vmem_limit = int(min(max(2 * est + 8 * 2 ** 20, 16 * 2 ** 20), 64 * 2 ** 20))

    kernel = functools.partial(_fused_duc_kernel, nb=nb, h=h)

    out_rows = pl.pallas_call(
        kernel,
        out_shape=jax.ShapeDtypeStruct((steps, nb * h, n2), jnp.float32),
        grid=(steps,),
        in_specs=[
            pl.BlockSpec((1, mp, k1), lambda i: (i, 0, 0)),   # per-step image rows
            # Constant index maps: fetched once, resident across the grid.
            pl.BlockSpec((3, k1, n1), lambda i: (0, 0, 0)),   # Toeplitz conv1
            pl.BlockSpec((3, n1, n2), lambda i: (0, 0, 0)),   # Toeplitz conv2 (double-folded)
            pl.BlockSpec((1, n1), lambda i: (0, 0)),          # BN shift row
            pl.BlockSpec((1, n2), lambda i: (0, 0)),          # conv2 bias row
        ],
        out_specs=pl.BlockSpec((1, nb * h, n2), lambda i: (i, 0, 0)),
        scratch_shapes=[pltpu.VMEM((mp, n1), jnp.float32)],
        compiler_params=pltpu.CompilerParams(
            dimension_semantics=("parallel",),
            vmem_limit_bytes=vmem_limit),
    )(xr, t1, t2, s1, b2r)

    # Output formatting: rows -> (n, H, W, 16*out) -> undo the two folded
    # shuffles (inner = suffle1 level, outer = DUC level) -> NCHW.
    y = out_rows.reshape(n, h, w, n2 // w)
    y = pixel_shuffle_nhwc(y, 2)
    y = pixel_shuffle_nhwc(y, 2)                       # (n, 4H, 4W, out_ch)
    return jnp.transpose(y, (0, 3, 1, 2))


# ----------------------------------------------------------------------------
# Pure-JAX reference that mirrors the original module structure exactly
# (validates both the Pallas kernel and all weight folding).
# ----------------------------------------------------------------------------
def _ref_conv(x, w):
    return jax.lax.conv_general_dilated(
        x, w, (1, 1), "SAME", dimension_numbers=("NHWC", "HWIO", "NHWC"))


def topdown_1duc_reference(x_nchw, params):
    x = jnp.transpose(x_nchw, (0, 2, 3, 1))
    x = pixel_shuffle_nhwc(x, 2)                                   # suffle1
    x = _ref_conv(x, params["w1"]) * params["bn_scale"] + params["bn_shift"]
    x = jnp.maximum(x, 0.0)                                        # duc1 conv+bn+relu
    x = pixel_shuffle_nhwc(x, 2)                                   # duc1 shuffle
    x = _ref_conv(x, params["w2"]) + params["b2"]                  # conv_out
    return jnp.transpose(x, (0, 3, 1, 2))


if __name__ == "__main__":
    in_channels, out_channels = 16, 4
    batch, height, width = 4, 8, 8

    key = jax.random.PRNGKey(0)
    kx, kp = jax.random.split(key)
    x = jax.random.normal(kx, (batch, in_channels, height, width), jnp.float32)
    params = make_params(kp, in_channels, out_channels, height, width)

    out = jax.block_until_ready(topdown_1duc_forward(x, params))
    assert out.shape == (batch, out_channels, 4 * height, 4 * width), out.shape

    ref = jax.block_until_ready(topdown_1duc_reference(x, params))
    # bf16 MXU operands (f32 accumulation) -> loosened parity tolerance.
    max_err = float(jnp.max(jnp.abs(out - ref)))
    assert jnp.allclose(out, ref, atol=8e-2, rtol=8e-2), max_err

    print("KERNEL_OK")
</pallas_src>

<mosaic_0001>
module attributes {stable_mosaic.version = 11 : i64} {
  func.func @_fused_duc_kernel(%arg0: i32, %arg1: memref<1x20x128xbf16, #tpu.memory_space<vmem>>, %arg2: memref<3x128x256xbf16, #tpu.memory_space<vmem>>, %arg3: memref<3x256x512xbf16, #tpu.memory_space<vmem>>, %arg4: memref<1x256xf32, #tpu.memory_space<vmem>>, %arg5: memref<1x512xf32, #tpu.memory_space<vmem>>, %arg6: memref<1x16x512xf32, #tpu.memory_space<vmem>>, %arg7: memref<20x256xf32, #tpu.memory_space<vmem>>) attributes {dimension_semantics = [#tpu.dimension_semantics<parallel>], iteration_bounds = array<i64: 2>, scalar_prefetch = 0 : i64, scratch_operands = 1 : i64, tpu.core_type = #tpu.core_type<tc>, window_params = [{transform_indices = @transform_0, window_bounds = array<i64: 1, 20, 128>}, {pipeline_mode = #tpu.pipeline_mode<synchronous>, transform_indices = @transform_1, window_bounds = array<i64: 3, 128, 256>}, {pipeline_mode = #tpu.pipeline_mode<synchronous>, transform_indices = @transform_2, window_bounds = array<i64: 3, 256, 512>}, {pipeline_mode = #tpu.pipeline_mode<synchronous>, transform_indices = @transform_3, window_bounds = array<i64: 1, 256>}, {pipeline_mode = #tpu.pipeline_mode<synchronous>, transform_indices = @transform_4, window_bounds = array<i64: 1, 512>}, {transform_indices = @transform_5, window_bounds = array<i64: 1, 16, 512>}]} {
    %c0 = arith.constant 0 : index
    %c0_0 = arith.constant 0 : index
    %c0_1 = arith.constant 0 : index
    %0 = vector.load %arg1[%c0, %c0_0, %c0_1] : memref<1x20x128xbf16, #tpu.memory_space<vmem>>, vector<1x20x128xbf16>
    %1 = vector.shape_cast %0 : vector<1x20x128xbf16> to vector<20x128xbf16>
    %c0_2 = arith.constant 0 : index
    %c0_3 = arith.constant 0 : index
    %2 = vector.load %arg4[%c0_2, %c0_3] : memref<1x256xf32, #tpu.memory_space<vmem>>, vector<1x256xf32>
    %3 = vector.shape_cast %2 : vector<1x256xf32> to vector<1x256xf32>
    %4 = vector.broadcast %3 : vector<1x256xf32> to vector<18x256xf32>
    %5 = vector.extract_strided_slice %1 {offsets = [0, 0], sizes = [18, 128], strides = [1, 1]} : vector<20x128xbf16> to vector<18x128xbf16>
    %c0_4 = arith.constant 0 : index
    %c0_5 = arith.constant 0 : index
    %c0_6 = arith.constant 0 : index
    %6 = vector.load %arg2[%c0_4, %c0_5, %c0_6] : memref<3x128x256xbf16, #tpu.memory_space<vmem>>, vector<1x128x256xbf16>
    %7 = vector.shape_cast %6 : vector<1x128x256xbf16> to vector<128x256xbf16>
    %cst = arith.constant dense<0.000000e+00> : vector<18x256xf32>
    %8 = tpu.matmul %5, %7, %cst {dimension_numbers = #tpu.dot_dimension_numbers<[1], [0], [0], [1], [0, 0, 1, 1], [], []>} : vector<18x128xbf16>, vector<128x256xbf16>, vector<18x256xf32> -> vector<18x256xf32>
    %9 = arith.addf %4, %8 : vector<18x256xf32>
    %10 = vector.extract_strided_slice %1 {offsets = [1, 0], sizes = [18, 128], strides = [1, 1]} : vector<20x128xbf16> to vector<18x128xbf16>
    %c1 = arith.constant 1 : index
    %c0_7 = arith.constant 0 : index
    %c0_8 = arith.constant 0 : index
    %11 = vector.load %arg2[%c1, %c0_7, %c0_8] : memref<3x128x256xbf16, #tpu.memory_space<vmem>>, vector<1x128x256xbf16>
    %12 = vector.shape_cast %11 : vector<1x128x256xbf16> to vector<128x256xbf16>
    %cst_9 = arith.constant dense<0.000000e+00> : vector<18x256xf32>
    %13 = tpu.matmul %10, %12, %cst_9 {dimension_numbers = #tpu.dot_dimension_numbers<[1], [0], [0], [1], [0, 0, 1, 1], [], []>} : vector<18x128xbf16>, vector<128x256xbf16>, vector<18x256xf32> -> vector<18x256xf32>
    %14 = arith.addf %9, %13 : vector<18x256xf32>
    %15 = vector.extract_strided_slice %1 {offsets = [2, 0], sizes = [18, 128], strides = [1, 1]} : vector<20x128xbf16> to vector<18x128xbf16>
    %c2 = arith.constant 2 : index
    %c0_10 = arith.constant 0 : index
    %c0_11 = arith.constant 0 : index
    %16 = vector.load %arg2[%c2, %c0_10, %c0_11] : memref<3x128x256xbf16, #tpu.memory_space<vmem>>, vector<1x128x256xbf16>
    %17 = vector.shape_cast %16 : vector<1x128x256xbf16> to vector<128x256xbf16>
    %cst_12 = arith.constant dense<0.000000e+00> : vector<18x256xf32>
    %18 = tpu.matmul %15, %17, %cst_12 {dimension_numbers = #tpu.dot_dimension_numbers<[1], [0], [0], [1], [0, 0, 1, 1], [], []>} : vector<18x128xbf16>, vector<128x256xbf16>, vector<18x256xf32> -> vector<18x256xf32>
    %19 = arith.addf %14, %18 : vector<18x256xf32>
    %cst_13 = arith.constant 0.000000e+00 : f32
    %20 = vector.broadcast %cst_13 : f32 to vector<18x256xf32>
    %21 = arith.maximumf %19, %20 : vector<18x256xf32>
    %c1_14 = arith.constant 1 : index
    %c0_15 = arith.constant 0 : index
    %22 = vector.load %arg7[%c1_14, %c0_15] : memref<20x256xf32, #tpu.memory_space<vmem>>, vector<18x256xf32>
    tpu.vector_store %arg7[%c1_14, %c0_15], %21 {strides = array<i32>} : memref<20x256xf32, #tpu.memory_space<vmem>>, vector<18x256xf32>,
    %cst_16 = arith.constant 0.000000e+00 : f32
    %23 = vector.broadcast %cst_16 : f32 to vector<1x256xf32>
    %c0_17 = arith.constant 0 : index
    %c0_18 = arith.constant 0 : index
    %24 = vector.load %arg7[%c0_17, %c0_18] : memref<20x256xf32, #tpu.memory_space<vmem>>, vector<1x256xf32>
    tpu.vector_store %arg7[%c0_17, %c0_18], %23 {strides = array<i32>} : memref<20x256xf32, #tpu.memory_space<vmem>>, vector<1x256xf32>,
    %c9 = arith.constant 9 : index
    %c0_19 = arith.constant 0 : index
    %25 = vector.load %arg7[%c9, %c0_19] : memref<20x256xf32, #tpu.memory_space<vmem>>, vector<1x256xf32>
    tpu.vector_store %arg7[%c9, %c0_19], %23 {strides = array<i32>} : memref<20x256xf32, #tpu.memory_space<vmem>>, vector<1x256xf32>,
    %c10 = arith.constant 10 : index
    %c0_20 = arith.constant 0 : index
    %26 = vector.load %arg7[%c10, %c0_20] : memref<20x256xf32, #tpu.memory_space<vmem>>, vector<1x256xf32>
    tpu.vector_store %arg7[%c10, %c0_20], %23 {strides = array<i32>} : memref<20x256xf32, #tpu.memory_space<vmem>>, vector<1x256xf32>,
    %c19 = arith.constant 19 : index
    %c0_21 = arith.constant 0 : index
    %27 = vector.load %arg7[%c19, %c0_21] : memref<20x256xf32, #tpu.memory_space<vmem>>, vector<1x256xf32>
    tpu.vector_store %arg7[%c19, %c0_21], %23 {strides = array<i32>} : memref<20x256xf32, #tpu.memory_space<vmem>>, vector<1x256xf32>,
    %c0_22 = arith.constant 0 : index
    %c0_23 = arith.constant 0 : index
    %28 = vector.load %arg7[%c0_22, %c0_23] : memref<20x256xf32, #tpu.memory_space<vmem>>, vector<20x256xf32>
    %c0_24 = arith.constant 0 : index
    %c0_25 = arith.constant 0 : index
    %29 = vector.load %arg5[%c0_24, %c0_25] : memref<1x512xf32, #tpu.memory_space<vmem>>, vector<1x512xf32>
    %30 = vector.shape_cast %29 : vector<1x512xf32> to vector<1x512xf32>
    %31 = vector.broadcast %30 : vector<1x512xf32> to vector<18x512xf32>
    %32 = vector.extract_strided_slice %28 {offsets = [0, 0], sizes = [18, 256], strides = [1, 1]} : vector<20x256xf32> to vector<18x256xf32>
    %33 = arith.truncf %32 : vector<18x256xf32> to vector<18x256xbf16>
    %c0_26 = arith.constant 0 : index
    %c0_27 = arith.constant 0 : index
    %c0_28 = arith.constant 0 : index
    %34 = vector.load %arg3[%c0_26, %c0_27, %c0_28] : memref<3x256x512xbf16, #tpu.memory_space<vmem>>, vector<1x256x512xbf16>
    %35 = vector.shape_cast %34 : vector<1x256x512xbf16> to vector<256x512xbf16>
    %cst_29 = arith.constant dense<0.000000e+00> : vector<18x512xf32>
    %36 = tpu.matmul %33, %35, %cst_29 {dimension_numbers = #tpu.dot_dimension_numbers<[1], [0], [0], [1], [0, 0, 1, 1], [], []>} : vector<18x256xbf16>, vector<256x512xbf16>, vector<18x512xf32> -> vector<18x512xf32>
    %37 = arith.addf %31, %36 : vector<18x512xf32>
    %38 = vector.extract_strided_slice %28 {offsets = [1, 0], sizes = [18, 256], strides = [1, 1]} : vector<20x256xf32> to vector<18x256xf32>
    %39 = arith.truncf %38 : vector<18x256xf32> to vector<18x256xbf16>
    %c1_30 = arith.constant 1 : index
    %c0_31 = arith.constant 0 : index
    %c0_32 = arith.constant 0 : index
    %40 = vector.load %arg3[%c1_30, %c0_31, %c0_32] : memref<3x256x512xbf16, #tpu.memory_space<vmem>>, vector<1x256x512xbf16>
    %41 = vector.shape_cast %40 : vector<1x256x512xbf16> to vector<256x512xbf16>
    %cst_33 = arith.constant dense<0.000000e+00> : vector<18x512xf32>
    %42 = tpu.matmul %39, %41, %cst_33 {dimension_numbers = #tpu.dot_dimension_numbers<[1], [0], [0], [1], [0, 0, 1, 1], [], []>} : vector<18x256xbf16>, vector<256x512xbf16>, vector<18x512xf32> -> vector<18x512xf32>
    %43 = arith.addf %37, %42 : vector<18x512xf32>
    %44 = vector.extract_strided_slice %28 {offsets = [2, 0], sizes = [18, 256], strides = [1, 1]} : vector<20x256xf32> to vector<18x256xf32>
    %45 = arith.truncf %44 : vector<18x256xf32> to vector<18x256xbf16>
    %c2_34 = arith.constant 2 : index
    %c0_35 = arith.constant 0 : index
    %c0_36 = arith.constant 0 : index
    %46 = vector.load %arg3[%c2_34, %c0_35, %c0_36] : memref<3x256x512xbf16, #tpu.memory_space<vmem>>, vector<1x256x512xbf16>
    %47 = vector.shape_cast %46 : vector<1x256x512xbf16> to vector<256x512xbf16>
    %cst_37 = arith.constant dense<0.000000e+00> : vector<18x512xf32>
    %48 = tpu.matmul %45, %47, %cst_37 {dimension_numbers = #tpu.dot_dimension_numbers<[1], [0], [0], [1], [0, 0, 1, 1], [], []>} : vector<18x256xbf16>, vector<256x512xbf16>, vector<18x512xf32> -> vector<18x512xf32>
    %49 = arith.addf %43, %48 : vector<18x512xf32>
    %50 = vector.extract_strided_slice %49 {offsets = [0, 0], sizes = [8, 512], strides = [1, 1]} : vector<18x512xf32> to vector<8x512xf32>
    %51 = vector.extract_strided_slice %49 {offsets = [10, 0], sizes = [8, 512], strides = [1, 1]} : vector<18x512xf32> to vector<8x512xf32>
    %52 = tpu.concatenate %50, %51 in 0 : vector<8x512xf32>, vector<8x512xf32> -> vector<16x512xf32>
    %53 = vector.shape_cast %52 : vector<16x512xf32> to vector<1x16x512xf32>
    %c0_38 = arith.constant 0 : index
    %c0_39 = arith.constant 0 : index
    %c0_40 = arith.constant 0 : index
    %54 = vector.load %arg6[%c0_38, %c0_39, %c0_40] : memref<1x16x512xf32, #tpu.memory_space<vmem>>, vector<1x16x512xf32>
    tpu.vector_store %arg6[%c0_38, %c0_39, %c0_40], %53 {strides = array<i32>} : memref<1x16x512xf32, #tpu.memory_space<vmem>>, vector<1x16x512xf32>,
    return
  }
  func.func @transform_0(%arg0: i32) -> (i32, i32, i32) {
    %c0_i32 = arith.constant 0 : i32
    %c0_i32_0 = arith.constant 0 : i32
    %c0_i32_1 = arith.constant 0 : i32
    return %arg0, %c0_i32, %c0_i32_0 : i32, i32, i32
  }
  func.func @transform_1(%arg0: i32) -> (i32, i32, i32) {
    %c0_i32 = arith.constant 0 : i32
    %c0_i32_0 = arith.constant 0 : i32
    %c0_i32_1 = arith.constant 0 : i32
    %c0_i32_2 = arith.constant 0 : i32
    return %c0_i32, %c0_i32_0, %c0_i32_1 : i32, i32, i32
  }
  func.func @transform_2(%arg0: i32) -> (i32, i32, i32) {
    %c0_i32 = arith.constant 0 : i32
    %c0_i32_0 = arith.constant 0 : i32
    %c0_i32_1 = arith.constant 0 : i32
    %c0_i32_2 = arith.constant 0 : i32
    return %c0_i32, %c0_i32_0, %c0_i32_1 : i32, i32, i32
  }
  func.func @transform_3(%arg0: i32) -> (i32, i32) {
    %c0_i32 = arith.constant 0 : i32
    %c0_i32_0 = arith.constant 0 : i32
    %c0_i32_1 = arith.constant 0 : i32
    return %c0_i32, %c0_i32_0 : i32, i32
  }
  func.func @transform_4(%arg0: i32) -> (i32, i32) {
    %c0_i32 = arith.constant 0 : i32
    %c0_i32_0 = arith.constant 0 : i32
    %c0_i32_1 = arith.constant 0 : i32
    return %c0_i32, %c0_i32_0 : i32, i32
  }
  func.func @transform_5(%arg0: i32) -> (i32, i32, i32) {
    %c0_i32 = arith.constant 0 : i32
    %c0_i32_0 = arith.constant 0 : i32
    %c0_i32_1 = arith.constant 0 : i32
    return %arg0, %c0_i32, %c0_i32_0 : i32, i32, i32
  }
}

</mosaic_0001>

<bundles_post_ra>
// kernel: topdown_1duc_forward.1
= control target key start
LH: loop header
LB: loop body
LE: loop exit
PB: predicated region body
PF: predicated region fallthrough
CT: control target
= control target key end

     0   :  { %10 = vsyncpa [#allocation4], 0  ;;  %s3606_s0 = inlined_call_operand.vmem [shape: bf16[2,20,128], index: 0, kind: input, shape index: {}]   ;;  %s3607_s1 = inlined_call_operand.hbm [shape: bf16[3,128,256], index: 1, kind: input, shape index: {}]   ;;  %s3608_s2 = inlined_call_operand.hbm [shape: bf16[3,256,512], index: 2, kind: input, shape index: {}]   ;;  %s3609_s3 = inlined_call_operand.hbm [shape: f32[1,256], index: 3, kind: input, shape index: {}]   ;;  %s3610_s4 = inlined_call_operand.hbm [shape: f32[1,512], index: 4, kind: input, shape index: {}]   ;;  %s3611_s5 = inlined_call_operand.vmem [shape: f32[2,16,512], index: 5, kind: output, shape index: {}]  }
   0x1   :  { %11 = vsyncpa [#allocation6], 0 }
   0x2   :  { %12 = vsyncpa [#allocation9], 0  ;;  %s3389_s18 = smov 0  }
   0x3 LB: > { %s3349_s19 = smov [#allocation5]   ;;  %s3395_s21 = sadd.s32 4294967295, %s3347_s18   ;;  %s3347_s18 = sphi %s3389_s18, %s18_s18  }
   0x4   : > { %s184_s20 = sshll.u32 %s3349_s19, 4  ;;  %p2548_p0 = scmp.ge.s32.totalorder %s3347_s18, 1  ;;  %s185_s20 = int_to_ptr.vmem [resolvable:$true] %s184_s20 }
   0x5   : > { %p159_p1 = scmp.lt.s32.totalorder %s3347_s18, 3  ;;  %p3612_p2 = scmp.eq.s32.totalorder %s3395_s21, 0 }
   0x6   : > { %s3350_s23 = smov [#allocation3]   ;;  %s3351_s26 = smov [#allocation7]  }
   0x7   : > { %p3400_p3 = pnand %p2548_p0, %p159_p1  ;;  %s171_s24 = sshll.u32 %s3350_s23, 4  ;;  %s3406_s24 = int_to_ptr.vmem [resolvable:$true] %s171_s24 }
   0x8   : > { %s3414_s27 = sshll.u32 %s3351_s26, 4  ;;  %s3236_s28 = scalar_lea.vmem %s185_s20, 24576  ;;  %s199_s27 = int_to_ptr.vmem [resolvable:$true] %s3414_s27 }
   0x9   : > { %p2824_p4 = pneg %p3400_p3  ;;  %p3237_p7 = scmp.ne.s32.totalorder %s185_s20, %s3236_s28 }
   0xa   : > { %p3244_p10 = scmp.lt.s32.totalorder %s185_s20, %s185_s20  ;;  %p3245_p11 = scmp.lt.s32.totalorder %s3236_s28, %s3236_s28 }
   0xb   : > { %p3410_p5 = pnand %p3612_p2, %p2824_p4 }
   0xc   : > { %p3246_p12 = por %p3245_p11, %p3244_p10 }
   0xd   : > { %p3227_p6 = pneg %p3410_p5 }
   0xf   : > { %p3239_p8 = pnand %p3237_p7, %p3227_p6 }
  0x11   : > { %p3240_p9 = pneg %p3239_p8 }
  0x13   : > { %p3247_p13 = pnand %p3246_p12, %p3240_p9 }
  0x15   : > { %3250 = shalt.err (!%p3247_p13)
}
  0x16   : > { %s3352_s29 = smov 256   ;;  %s3353_s30 = smov 16  }
  0x17   : > { %2830 = dma.hbm_to_vmem [thread:$0]  (!%p3410_p5), %s3608_s2, 24576, %s185_s20, [#allocation6], %s3352_s29, %s3352_s29, %s3353_s30  }
  0x18   : > { %s3262_s8 = scalar_lea.vmem %s3406_s24, 6144  ;;  %p3270_p7 = scmp.lt.s32.totalorder %s3406_s24, %s3406_s24 }
  0x19   : > { %p3263_p0 = scmp.ne.s32.totalorder %s3406_s24, %s3262_s8  ;;  %p3271_p8 = scmp.lt.s32.totalorder %s3262_s8, %s3262_s8 }
  0x1b   : > { %p3265_p1 = pnand %p3263_p0, %p3227_p6  ;;  %p3272_p9 = por %p3271_p8, %p3270_p7 }
  0x1d   : > { %p3266_p4 = pneg %p3265_p1 }
  0x1f   : > { %p3273_p10 = pnand %p3272_p9, %p3266_p4 }
  0x21   : > { %3276 = shalt.err (!%p3273_p10)
}
  0x22   : > { %s3354_s9 = smov 128   ;;  %s3355_s10 = smov 8  }
  0x23   : > { %2827 = dma.hbm_to_vmem [thread:$0]  (!%p3410_p5), %s3607_s1, 6144, %s3406_s24, [#allocation4], %s3354_s9, %s3354_s9, %s3355_s10  }
  0x24   : > { %s3356_s13 = smov [#allocation8]   ;;  %s3288_s15 = scalar_lea.vmem %s199_s27, 32 }
  0x25   : > { %s209_s14 = sshll.u32 %s3356_s13, 4  ;;  %p3289_p11 = scmp.ne.s32.totalorder %s199_s27, %s3288_s15  ;;  %s210_s14 = int_to_ptr.vmem [resolvable:$true] %s209_s14 }
  0x26   : > { %p3296_p0 = scmp.lt.s32.totalorder %s199_s27, %s199_s27  ;;  %p3297_p1 = scmp.lt.s32.totalorder %s3288_s15, %s3288_s15 }
  0x27   : > { %p3291_p12 = pnand %p3289_p11, %p3227_p6 }
  0x28   : > { %p3298_p4 = por %p3297_p1, %p3296_p0 }
  0x29   : > { %p3292_p13 = pneg %p3291_p12 }
  0x2b   : > { %p3299_p7 = pnand %p3298_p4, %p3292_p13 }
  0x2d   : > { %3302 = shalt.err (!%p3299_p7)
}
  0x2e   : > { %2833 = dma.hbm_to_vmem [thread:$0]  (!%p3410_p5), %s3609_s3, 32, %s199_s27, [#allocation6]  }
  0x2f   : > { %s3314_s19 = scalar_lea.vmem %s210_s14, 64  ;;  %p3322_p11 = scmp.lt.s32.totalorder %s210_s14, %s210_s14 }
  0x30   : > { %p3315_p8 = scmp.ne.s32.totalorder %s210_s14, %s3314_s19  ;;  %p3323_p12 = scmp.lt.s32.totalorder %s3314_s19, %s3314_s19 }
  0x32   : > { %p3317_p9 = pnand %p3315_p8, %p3227_p6  ;;  %p3324_p2 = por %p3323_p12, %p3322_p11 }
  0x34   : > { %p3318_p10 = pneg %p3317_p9 }
  0x36   : > { %p3325_p0 = pnand %p3324_p2, %p3318_p10 }
  0x38   : > { %3328 = shalt.err (!%p3325_p0)
}
  0x39   : > { %2836 = dma.hbm_to_vmem [thread:$0]  (!%p3410_p5), %s3610_s4, 64, %s210_s14, [#allocation9]  }
  0x3a   : > { %230 = sbr.rel (%p3400_p3) target bundleno = 693 (0x2b5), region = 40  ;;  %p3615_p13 = scmp.eq.s32.totalorder (!%p3400_p3), %s3395_s21, 0 }
  0x3f   : > { %3334 = dma.done.wait (%p3615_p13), [#allocation4], 6144   ;;  %p3616_p6 = pmov %p3615_p13 }
  0x41   : > { %3336 = vsyncadd (%p3616_p6), [#allocation4], 4294961152  ;;  %p3617_p1 = pmov %p3616_p6 }
  0x43   : > { %3338 = dma.done.wait (%p3617_p1), [#allocation6], 24608   ;;  %p3618_p2 = pmov %p3617_p1 }
  0x44   : > { %p3619_p4 = pmov %p3617_p1 }
  0x45   : > { %3340 = vsyncadd (%p3618_p2), [#allocation6], 4294942688 }
  0x46   : > { %3342 = dma.done.wait (%p3619_p4), [#allocation9], 64   ;;  %p3620_p5 = pmov %p3617_p1 }
  0x47   : > { %v3357_v0 = vmov 0   ;;  %v2863_v1 = vld [vmem:[#allocation3 + $0x74] ss:$8 sps:$4 sm:$0xff]   ;;  %v2865_v2 = vld [vmem:[#allocation3 + $0x70] ss:$8 sps:$4 sm:$0xff]   ;;  %p270_p3 = scmp.lt.s32.totalorder %s3395_s21, 1 }
  0x48   : > { %3344 = vsyncadd (%p3620_p5), [#allocation9], 4294967232  ;;  %434 = vmatprep.mubr.bf16.mxu0 %v3357_v0  ;;  %606 = vmatprep.mubr.bf16.mxu1 %v3357_v0  ;;  %v2866_v3 = vld [vmem:[#allocation3 + $0xf4] ss:$8 sps:$4 sm:$0xff]   ;;  %v2868_v4 = vld [vmem:[#allocation3 + $0xf0] ss:$8 sps:$4 sm:$0xff]  }
  0x49   : > { %402 = vmatprep.subr.bf16.mxu0 %v2863_v1  ;;  %v2869_v5 = vld [vmem:[#allocation3 + $0x64] ss:$8 sps:$4 sm:$0xff]   ;;  %v2871_v6 = vld [vmem:[#allocation3 + $0x60] ss:$8 sps:$4 sm:$0xff]   ;;  %574 = vmatprep.subr.bf16.mxu1 %v2866_v3  ;;  %v2875_v9 = vld [vmem:[#allocation3 + $0x54] ss:$8 sps:$4 sm:$0xff]  }
  0x4a   : > { %403 = vmatpush1.bf16.msra.mxu0 %v2865_v2  ;;  %v2872_v7 = vld [vmem:[#allocation3 + $0xe4] ss:$8 sps:$4 sm:$0xff]   ;;  %575 = vmatpush1.bf16.msra.mxu1 %v2868_v4  ;;  %v2874_v8 = vld [vmem:[#allocation3 + $0xe0] ss:$8 sps:$4 sm:$0xff]   ;;  %v2877_v10 = vld [vmem:[#allocation3 + $0x50] ss:$8 sps:$4 sm:$0xff]  }
  0x4b   : > { %404 = vmatprep.subr.bf16.mxu0 %v2869_v5  ;;  %576 = vmatprep.subr.bf16.mxu1 %v2872_v7  ;;  %v2878_v11 = vld [vmem:[#allocation3 + $0xd4] ss:$8 sps:$4 sm:$0xff]   ;;  %v2881_v12 = vld [vmem:[#allocation3 + $0x44] ss:$8 sps:$4 sm:$0xff]   ;;  %v2880_v13 = vld [vmem:[#allocation3 + $0xd0] ss:$8 sps:$4 sm:$0xff]  }
  0x4c   : > { %v2884_v14 = vld [vmem:[#allocation3 + $0xc4] ss:$8 sps:$4 sm:$0xff]   ;;  %v2883_v15 = vld [vmem:[#allocation3 + $0x40] ss:$8 sps:$4 sm:$0xff]   ;;  %s3624_s21 = smov (!%p270_p3, %s3395_s21), 1  ;;  %vm648_vm1 = vcmask 1046528  }
  0x4d   : > { %v2887_v16 = vld [vmem:[#allocation3 + $0x34] ss:$8 sps:$4 sm:$0xff]   ;;  %v2886_v17 = vld [vmem:[#allocation3 + $0xc0] ss:$8 sps:$4 sm:$0xff]   ;;  %v2889_v19 = vld [vmem:[#allocation3 + $0x30] ss:$8 sps:$4 sm:$0xff]  }
  0x4e   : > { %405 = vmatpush1.bf16.msra.mxu0 %v2871_v6  ;;  %577 = vmatpush1.bf16.msra.mxu1 %v2874_v8  ;;  %v2890_v18 = vld [vmem:[#allocation3 + $0xb4] ss:$8 sps:$4 sm:$0xff]   ;;  %s2807_s22 = smul.u32 12, %s3624_s21  ;;  %v2893_v20 = vld [vmem:[#allocation3 + $0x24] ss:$8 sps:$4 sm:$0xff]   ;;  %vm803_vm3 = vcmask 1040384  }
  0x4f   : > { %406 = vmatprep.subr.bf16.mxu0 %v2875_v9  ;;  %578 = vmatprep.subr.bf16.mxu1 %v2878_v11  ;;  %v2892_v21 = vld [vmem:[#allocation3 + $0xb0] ss:$8 sps:$4 sm:$0xff]   ;;  %v2896_v22 = vld [vmem:[#allocation3 + $0xa4] ss:$8 sps:$4 sm:$0xff]   ;;  %v2895_v23 = vld [vmem:[#allocation3 + $0x20] ss:$8 sps:$4 sm:$0xff]  }
  0x50   : > { %v2898_v24 = vld [vmem:[#allocation3 + $0xa0] ss:$8 sps:$4 sm:$0xff]   ;;  %s274_s26 = scalar_lea.vmem %s3606_s0, %s2807_s22  ;;  %v2899_v25 = vld [vmem:[#allocation3 + $0x14] ss:$8 sps:$4 sm:$0xff]   ;;  %v2901_v29 = vld [vmem:[#allocation3 + $0x10] ss:$8 sps:$4 sm:$0xff]  }
  0x51   : > { %v2902_v26 = vld [vmem:[#allocation3 + $0x94] ss:$8 sps:$4 sm:$0xff]   ;;  %v3482_v28 = vld [vmem:[%s274_s26 + $0x8] ss:$0 sps:$4 sm:$0x33]   ;;  %s2806_s27 = sshll.u32 %s3624_s21, 6 }
  0x52   : > { %407 = vmatpush1.bf16.msra.mxu0 %v2877_v10  ;;  %579 = vmatpush1.bf16.msra.mxu1 %v2880_v13  ;;  %v3480_v27 = vld [vmem:[%s274_s26] sm:$0xff]   ;;  %v2905_v30 = vld [vmem:[#allocation3 + $0x4] ss:$8 sps:$4 sm:$0xff]   ;;  %v485_v34 = vshll.u32 %v3482_v28, 16  ;;  %v2907_v37 = vld [vmem:[#allocation3] ss:$8 sps:$4 sm:$0xff]   ;;  %s3587_s30 = scalar_lea.vmem %s3611_s5, %s2806_s27 }
  0x53   : > { %408 = vmatprep.subr.bf16.mxu0 %v2881_v12  ;;  %580 = vmatprep.subr.bf16.mxu1 %v2884_v14  ;;  %v480_v31 = vshll.u32 %v3480_v27, 16  ;;  %v2904_v32 = vld [vmem:[#allocation3 + $0x90] ss:$8 sps:$4 sm:$0xff]   ;;  %v478_v33 = vshrl.u32 %v3480_v27, 16  ;;  %v2908_v35 = vld [vmem:[#allocation3 + $0x84] ss:$8 sps:$4 sm:$0xff]  }
  0x54   : > { %v2915_v38 = vld [vmem:[#allocation3 + $0x174] ss:$8 sps:$4 sm:$0xff]   ;;  %v2910_v39 = vld [vmem:[#allocation3 + $0x80] ss:$8 sps:$4 sm:$0xff]   ;;  %v487_v41 = vrot.slane %v485_v34, 1  ;;  %v489_v49 = vshrl.u32 %v3482_v28, 16 }
  0x55   : > { %v482_v36 = vrot.slane %v480_v31, 1  ;;  %vm476_vm0 = vsmask.f32 7424  ;;  %v2913_v42 = vld [vmem:[#allocation3 + $0x170] ss:$8 sps:$4 sm:$0xff]   ;;  %v649_v2 = vrot.slane %v3480_v27, 1 }
  0x56   : > { %409 = vmatpush1.bf16.msra.mxu0 %v2883_v15  ;;  %581 = vmatpush1.bf16.msra.mxu1 %v2886_v17  ;;  %v2918_v43 = vld [vmem:[#allocation3 + $0x164] ss:$8 sps:$4 sm:$0xff]   ;;  %v2916_v45 = vld [vmem:[#allocation3 + $0x160] ss:$8 sps:$4 sm:$0xff]   ;;  %v2921_v48 = vld [vmem:[#allocation3 + $0x154] ss:$8 sps:$4 sm:$0xff]   ;;  %v491_v54 = vor.u32 %v489_v49, %v487_v41 }
  0x57   : > { %410 = vmatprep.subr.bf16.mxu0 %v2887_v16  ;;  %582 = vmatprep.subr.bf16.mxu1 %v2890_v18  ;;  %v483_v40 = vor.u32 %v482_v36, %v478_v33  ;;  %v2937_v46 = vld [vmem:[#allocation5 + $0xe0] ss:$16 sps:$4 sm:$0xff]   ;;  %v2939_v47 = vld [vmem:[#allocation5 + $0xe4] ss:$16 sps:$4 sm:$0xff]   ;;  %v2942_v1 = vld [vmem:[#allocation5 + $0xec] ss:$16 sps:$4 sm:$0xff]  }
  0x58   : > { %v2945_v50 = vld [vmem:[#allocation5 + $0xc4] ss:$16 sps:$4 sm:$0xff]   ;;  %v2943_v51 = vld [vmem:[#allocation5 + $0xc0] ss:$16 sps:$4 sm:$0xff]   ;;  %v650_v3 = vrot.slane %v3482_v28, 1  ;;  %v3358_v49 = vmov 0.0  }
  0x59   : > { %v488_v44 = vsel %vm476_vm0, %v483_v40, %v487_v41  ;;  %v2919_v52 = vld [vmem:[#allocation3 + $0x150] ss:$8 sps:$4 sm:$0xff]   ;;  %v2924_v53 = vld [vmem:[#allocation3 + $0x144] ss:$8 sps:$4 sm:$0xff]   ;;  %v2922_v55 = vld [vmem:[#allocation3 + $0x140] ss:$8 sps:$4 sm:$0xff]  }
  0x5a   : > { %411 = vmatpush1.bf16.msra.mxu0 %v2889_v19  ;;  %583 = vmatpush1.bf16.msra.mxu1 %v2892_v21  ;;  %v2927_v56 = vld [vmem:[#allocation3 + $0x134] ss:$8 sps:$4 sm:$0xff]   ;;  %v2925_v57 = vld [vmem:[#allocation3 + $0x130] ss:$8 sps:$4 sm:$0xff]   ;;  %v2930_v58 = vld [vmem:[#allocation3 + $0x124] ss:$8 sps:$4 sm:$0xff]   ;;  %v651_v6 = vsel %vm648_vm1, %v649_v2, %v650_v3 }
  0x5b   : > { %412 = vmatprep.subr.bf16.mxu0 %v2893_v20  ;;  %584 = vmatprep.subr.bf16.mxu1 %v2896_v22  ;;  %v2928_v59 = vld [vmem:[#allocation3 + $0x120] ss:$8 sps:$4 sm:$0xff]   ;;  %v2933_v60 = vld [vmem:[#allocation3 + $0x114] ss:$8 sps:$4 sm:$0xff]   ;;  %v2931_v61 = vld [vmem:[#allocation3 + $0x110] ss:$8 sps:$4 sm:$0xff]  }
  0x5c   : > { %v2936_v62 = vld [vmem:[#allocation3 + $0x104] ss:$8 sps:$4 sm:$0xff]   ;;  %v2934_v63 = vld [vmem:[#allocation3 + $0x100] ss:$8 sps:$4 sm:$0xff]   ;;  %vm2425_vm4 = vcmask 1045504  }
  0x5d   : > { %v2940_v4 = vld [vmem:[#allocation5 + $0xe8] ss:$16 sps:$4 sm:$0xff]   ;;  %v2948_v5 = vld [vmem:[#allocation5 + $0xcc] ss:$16 sps:$4 sm:$0xff]   ;;  %v2951_v8 = vld [vmem:[#allocation5 + $0xa4] ss:$16 sps:$4 sm:$0xff]  }
  0x5e   : > { %413 = vmatpush1.bf16.msra.mxu0 %v2895_v23  ;;  %585 = vmatpush1.bf16.msra.mxu1 %v2898_v24  ;;  %v2946_v7 = vld [vmem:[#allocation5 + $0xc8] ss:$16 sps:$4 sm:$0xff]   ;;  %v2954_v9 = vld [vmem:[#allocation5 + $0xac] ss:$16 sps:$4 sm:$0xff]   ;;  %v2949_v10 = vld [vmem:[#allocation5 + $0xa0] ss:$16 sps:$4 sm:$0xff]  }
  0x5f   : > { %414 = vmatprep.subr.bf16.mxu0 %v2899_v25  ;;  %586 = vmatprep.subr.bf16.mxu1 %v2902_v26  ;;  %v2952_v11 = vld [vmem:[#allocation5 + $0xa8] ss:$16 sps:$4 sm:$0xff]   ;;  %v2957_v12 = vld [vmem:[#allocation5 + $0x84] ss:$16 sps:$4 sm:$0xff]   ;;  %v2960_v13 = vld [vmem:[#allocation5 + $0x8c] ss:$16 sps:$4 sm:$0xff]  }
  0x60   : > { %v2955_v14 = vld [vmem:[#allocation5 + $0x80] ss:$16 sps:$4 sm:$0xff]   ;;  %v2958_v15 = vld [vmem:[#allocation5 + $0x88] ss:$16 sps:$4 sm:$0xff]   ;;  %v2966_v16 = vld [vmem:[#allocation5 + $0x6c] ss:$16 sps:$4 sm:$0xff]  }
  0x61   : > { %v2961_v17 = vld [vmem:[#allocation5 + $0x60] ss:$16 sps:$4 sm:$0xff]   ;;  %v2964_v18 = vld [vmem:[#allocation5 + $0x68] ss:$16 sps:$4 sm:$0xff]   ;;  %v2969_v19 = vld [vmem:[#allocation5 + $0x44] ss:$16 sps:$4 sm:$0xff]  }
  0x62   : > { %415 = vmatpush1.bf16.msra.mxu0 %v2901_v29  ;;  %587 = vmatpush1.bf16.msra.mxu1 %v2904_v32  ;;  %v2967_v20 = vld [vmem:[#allocation5 + $0x40] ss:$16 sps:$4 sm:$0xff]   ;;  %v2970_v21 = vld [vmem:[#allocation5 + $0x48] ss:$16 sps:$4 sm:$0xff]   ;;  %v2972_v22 = vld [vmem:[#allocation5 + $0x4c] ss:$16 sps:$4 sm:$0xff]  }
  0x63   : > { %416 = vmatprep.subr.bf16.mxu0 %v2905_v30  ;;  %588 = vmatprep.subr.bf16.mxu1 %v2908_v35  ;;  %v2975_v23 = vld [vmem:[#allocation5 + $0x24] ss:$16 sps:$4 sm:$0xff]   ;;  %v2978_v24 = vld [vmem:[#allocation5 + $0x2c] ss:$16 sps:$4 sm:$0xff]   ;;  %v2973_v25 = vld [vmem:[#allocation5 + $0x20] ss:$16 sps:$4 sm:$0xff]  }
  0x64   : > { %v2976_v26 = vld [vmem:[#allocation5 + $0x28] ss:$16 sps:$4 sm:$0xff]   ;;  %v2979_v29 = vld [vmem:[#allocation5] ss:$16 sps:$4 sm:$0xff]   ;;  %v2987_v31 = vld [vmem:[#allocation5 + $0x1e4] ss:$16 sps:$4 sm:$0xff]  }
  0x65   : > { %v2982_v30 = vld [vmem:[#allocation5 + $0x8] ss:$16 sps:$4 sm:$0xff]   ;;  %v2990_v32 = vld [vmem:[#allocation5 + $0x1ec] ss:$16 sps:$4 sm:$0xff]   ;;  %v2985_v33 = vld [vmem:[#allocation5 + $0x1e0] ss:$16 sps:$4 sm:$0xff]  }
  0x66   : > { %417 = vmatpush1.bf16.msra.mxu0 %v2907_v37  ;;  %589 = vmatpush1.bf16.msra.mxu1 %v2910_v39  ;;  %v2988_v34 = vld [vmem:[#allocation5 + $0x1e8] ss:$16 sps:$4 sm:$0xff]   ;;  %v2993_v35 = vld [vmem:[#allocation5 + $0x1c4] ss:$16 sps:$4 sm:$0xff]   ;;  %v2996_v36 = vld [vmem:[#allocation5 + $0x1cc] ss:$16 sps:$4 sm:$0xff]  }
  0x67   : > { %734 = vmatprep.subr.bf16.mxu0 %v2915_v38  ;;  %1257 = vmatprep.subr.bf16.mxu1 %v2939_v47  ;;  %v2991_v37 = vld [vmem:[#allocation5 + $0x1c0] ss:$16 sps:$4 sm:$0xff]   ;;  %v2994_v38 = vld [vmem:[#allocation5 + $0x1c8] ss:$16 sps:$4 sm:$0xff]   ;;  %v2999_v39 = vld [vmem:[#allocation5 + $0x1a4] ss:$16 sps:$4 sm:$0xff]  }
  0x68   : > { %v3002_v40 = vld [vmem:[#allocation5 + $0x1ac] ss:$16 sps:$4 sm:$0xff]   ;;  %v2997_v41 = vld [vmem:[#allocation5 + $0x1a0] ss:$16 sps:$4 sm:$0xff]   ;;  %v3006_v47 = vld [vmem:[#allocation5 + $0x188] ss:$16 sps:$4 sm:$0xff]  }
  0x69   : > { %435 = vmatmul.mubr.bf16.vlgmr.msra.gmra.mxu0 %v3480_v27  ;;  %607 = vmatmul.mubr.bf16.vlgmr.msra.gmra.mxu1 %v488_v44  ;;  %v2981_v27 = vld [vmem:[#allocation5 + $0x4] ss:$16 sps:$4 sm:$0xff]   ;;  %v3008_v44 = vld [vmem:[#allocation5 + $0x18c] ss:$16 sps:$4 sm:$0xff]  }
  0x6a   : > { %735 = vmatpush1.bf16.msra.mxu0 %v2913_v42  ;;  %444 = vmatprep.mubr.bf16.mxu0 %v3357_v0  ;;  %v3000_v42 = vld [vmem:[#allocation5 + $0x1a8] ss:$16 sps:$4 sm:$0xff]   ;;  %v3032_v2 = vld [vmem:[#allocation5 + $0x10c] ss:$16 sps:$4 sm:$0xff]  }
  0x6b   : > { %736 = vmatprep.subr.bf16.mxu0 %v2918_v43  ;;  %616 = vmatprep.mubr.bf16.mxu1 %v3357_v0  ;;  %v3005_v43 = vld [vmem:[#allocation5 + $0x184] ss:$16 sps:$4 sm:$0xff]  }
  0x6c   : > { %1258 = vmatpush1.bf16.msra.mxu1 %v2937_v46  ;;  %v3003_v46 = vld [vmem:[#allocation5 + $0x180] ss:$16 sps:$4 sm:$0xff]  }
  0x6d   : > { %1259 = vmatprep.subr.bf16.mxu1 %v2945_v50  ;;  %v3011_v50 = vld [vmem:[#allocation5 + $0x164] ss:$16 sps:$4 sm:$0xff]  }
  0x6e   : > { %737 = vmatpush1.bf16.msra.mxu0 %v2916_v45  ;;  %v286_v45 = vlaneseq }
  0x6f   : > { %738 = vmatprep.subr.bf16.mxu0 %v2921_v48 }
  0x70   : > { %1260 = vmatpush1.bf16.msra.mxu1 %v2943_v51  ;;  %vm3498_vm2 = vcmp.lt.s32.totalorder %v286_v45, 256  ;;  %v3014_v51 = vld [vmem:[#allocation5 + $0x16c] ss:$16 sps:$4 sm:$0xff]  }
  0x71   : > { %445 = vmatmul.mubr.bf16.gmra.mxu0 %v3482_v28  ;;  %617 = vmatmul.mubr.bf16.gmra.mxu1 %v491_v54  ;;  %v2984_v28 = vld [vmem:[#allocation5 + $0xc] ss:$16 sps:$4 sm:$0xff]   ;;  %830 = vst.msk [vmem:[#allocation2] ss:$8 sm:$0x3] %vm3498_vm2, %v3358_v49 }
  0x72   : > { %739 = vmatpush1.bf16.msra.mxu0 %v2919_v52  ;;  %766 = vmatprep.mubr.bf16.mxu0 %v3357_v0  ;;  %839 = vst.msk [vmem:[#allocation2 + $0x23] ss:$8 sm:$0x3] %vm3498_vm2, %v3358_v49  ;;  %v3009_v52 = vld [vmem:[#allocation5 + $0x160] ss:$16 sps:$4 sm:$0xff]  }
  0x73   : > { %740 = vmatprep.subr.bf16.mxu0 %v2924_v53  ;;  %1261 = vmatprep.subr.bf16.mxu1 %v2951_v8  ;;  %v3012_v53 = vld [vmem:[#allocation5 + $0x168] ss:$16 sps:$4 sm:$0xff]   ;;  %v3017_v54 = vld [vmem:[#allocation5 + $0x144] ss:$16 sps:$4 sm:$0xff]  }
  0x74   : > { %1262 = vmatpush1.bf16.msra.mxu1 %v2949_v10 }
  0x75   : > { %1263 = vmatprep.subr.bf16.mxu1 %v2957_v12 }
  0x76   : > { %741 = vmatpush1.bf16.msra.mxu0 %v2922_v55  ;;  %v3020_v55 = vld [vmem:[#allocation5 + $0x14c] ss:$16 sps:$4 sm:$0xff]  }
  0x77   : > { %742 = vmatprep.subr.bf16.mxu0 %v2927_v56  ;;  %v3015_v56 = vld [vmem:[#allocation5 + $0x140] ss:$16 sps:$4 sm:$0xff]  }
  0x78   : > { %1264 = vmatpush1.bf16.msra.mxu1 %v2955_v14 }
  0x7a   : > { %743 = vmatpush1.bf16.msra.mxu0 %v2925_v57  ;;  %v3018_v57 = vld [vmem:[#allocation5 + $0x148] ss:$16 sps:$4 sm:$0xff]  }
  0x7b   : > { %744 = vmatprep.subr.bf16.mxu0 %v2930_v58  ;;  %v3023_v58 = vld [vmem:[#allocation5 + $0x124] ss:$16 sps:$4 sm:$0xff]  }
  0x7e   : > { %745 = vmatpush1.bf16.msra.mxu0 %v2928_v59  ;;  %v3026_v59 = vld [vmem:[#allocation5 + $0x12c] ss:$16 sps:$4 sm:$0xff]  }
  0x7f   : > { %746 = vmatprep.subr.bf16.mxu0 %v2933_v60  ;;  %v3021_v60 = vld [vmem:[#allocation5 + $0x120] ss:$16 sps:$4 sm:$0xff]  }
  0x82   : > { %747 = vmatpush1.bf16.msra.mxu0 %v2931_v61  ;;  %v3024_v61 = vld [vmem:[#allocation5 + $0x128] ss:$16 sps:$4 sm:$0xff]  }
  0x83   : > { %748 = vmatprep.subr.bf16.mxu0 %v2936_v62  ;;  %v3027_v62 = vld [vmem:[#allocation5 + $0x100] ss:$16 sps:$4 sm:$0xff]  }
  0x86   : > { %749 = vmatpush1.bf16.msra.mxu0 %v2934_v63  ;;  %v3029_v63 = vld [vmem:[#allocation5 + $0x104] ss:$16 sps:$4 sm:$0xff]  }
  0x87   : > { %1308 = vmatprep.subr.bf16.mxu0 %v2942_v1  ;;  %v3030_v1 = vld [vmem:[#allocation5 + $0x108] ss:$16 sps:$4 sm:$0xff]  }
  0x89   : > { %767 = vmatmul.mubr.bf16.vlgmr.msra.gmra.mxu0 %v651_v6 }
  0x8a   : > { %776 = vmatprep.mubr.bf16.mxu0 %v3357_v0  ;;  %1309 = vmatpush1.bf16.msra.mxu0 %v2940_v4  ;;  %v2963_v0 = vld [vmem:[#allocation5 + $0x64] ss:$16 sps:$4 sm:$0xff]   ;;  %v3038_v4 = vld [vmem:[#allocation5 + $0x2ec] ss:$16 sps:$4 sm:$0xff]  }
  0x8b   : > { %1310 = vmatprep.subr.bf16.mxu0 %v2948_v5  ;;  %1265 = vmatprep.subr.bf16.mxu1 %v2963_v0 }
  0x8c   : > { %1266 = vmatpush1.bf16.msra.mxu1 %v2961_v17 }
  0x8d   : > { %1267 = vmatprep.subr.bf16.mxu1 %v2969_v19  ;;  %v3508_v19 = vshrl.u32 %v286_v45, 7 }
  0x8e   : > { %1311 = vmatpush1.bf16.msra.mxu0 %v2946_v7 }
  0x8f   : > { %1312 = vmatprep.subr.bf16.mxu0 %v2954_v9 }
  0x90   : > { %1268 = vmatpush1.bf16.msra.mxu1 %v2967_v20 }
  0x91   : > { %777 = vmatmul.mubr.bf16.gmra.mxu0 %v650_v3  ;;  %1269 = vmatprep.subr.bf16.mxu1 %v2975_v23  ;;  %v3035_v3 = vld [vmem:[#allocation5 + $0x2e4] ss:$16 sps:$4 sm:$0xff]   ;;  %v292_v23 = vsub.s32 1, %v3508_v19 }
  0x92   : > { %1313 = vmatpush1.bf16.msra.mxu0 %v2952_v11 }
  0x93   : > { %1314 = vmatprep.subr.bf16.mxu0 %v2960_v13 }
  0x94   : > { %1270 = vmatpush1.bf16.msra.mxu1 %v2973_v25 }
  0x95   : > { %1271 = vmatprep.subr.bf16.mxu1 %v2981_v27 }
  0x96   : > { %1315 = vmatpush1.bf16.msra.mxu0 %v2958_v15 }
  0x97   : > { %1316 = vmatprep.subr.bf16.mxu0 %v2966_v16 }
  0x98   : > { %1272 = vmatpush1.bf16.msra.mxu1 %v2979_v29 }
  0x99   : > { %1273 = vmatprep.subr.bf16.mxu1 %v2987_v31 }
  0x9a   : > { %1317 = vmatpush1.bf16.msra.mxu0 %v2964_v18 }
  0x9b   : > { %1318 = vmatprep.subr.bf16.mxu0 %v2972_v22  ;;  %v284_v22 = vld [vmem:[#allocation7] sm:$0x3] }
  0x9c   : > { %1274 = vmatpush2.bf16.msra.mxu1 %v2985_v33  ;;  %v293_v25 = vrot.slane %v284_v22, %v292_v23 }
  0x9d   : > { %1275 = vmatprep.subr.bf16.mxu1 %v2993_v35 }
  0x9e   : > { %1319 = vmatpush1.bf16.msra.mxu0 %v2970_v21  ;;  %v288_v21 = vsub.s32 0, %v3508_v19 }
  0x9f   : > { %1320 = vmatprep.subr.bf16.mxu0 %v2978_v24 }
  0xa0   : > { %1276 = vmatpush2.bf16.msra.mxu1 %v2991_v37  ;;  %v289_v24 = vrot.slane %v284_v22, %v288_v21  ;;  %v3042_v22 = vld [vmem:[#allocation5 + $0x2c8] ss:$16 sps:$4 sm:$0xff]  }
  0xa1   : > { %1277 = vmatprep.subr.bf16.mxu1 %v2999_v39 }
  0xa2   : > { %1321 = vmatpush1.bf16.msra.mxu0 %v2976_v26 }
  0xa3   : > { %1322 = vmatprep.subr.bf16.mxu0 %v2984_v28 }
  0xa4   : > { %1278 = vmatpush2.bf16.msra.mxu1 %v2997_v41 }
  0xa5   : > { %1279 = vmatprep.subr.bf16.mxu1 %v3005_v43 }
  0xa6   : > { %1323 = vmatpush1.bf16.msra.mxu0 %v2982_v30 }
  0xa7   : > { %1324 = vmatprep.subr.bf16.mxu0 %v2990_v32 }
  0xa8   : > { %1280 = vmatpush2.bf16.msra.mxu1 %v3003_v46 }
  0xa9   : > { %1281 = vmatprep.subr.bf16.mxu1 %v3011_v50 }
  0xaa   : > { %1325 = vmatpush2.bf16.msra.mxu0 %v2988_v34 }
  0xab   : > { %1326 = vmatprep.subr.bf16.mxu0 %v2996_v36 }
  0xac   : > { %1282 = vmatpush2.bf16.msra.mxu1 %v3009_v52 }
  0xad   : > { %1283 = vmatprep.subr.bf16.mxu1 %v3017_v54 }
  0xae   : > { %1327 = vmatpush2.bf16.msra.mxu0 %v2994_v38 }
  0xaf   : > { %1328 = vmatprep.subr.bf16.mxu0 %v3002_v40 }
  0xb0   : > { %1284 = vmatpush2.bf16.msra.mxu1 %v3015_v56 }
  0xb1   : > { %1285 = vmatprep.subr.bf16.mxu1 %v3023_v58 }
  0xb2   : > { %1329 = vmatpush2.bf16.msra.mxu0 %v3000_v42 }
  0xb3   : > { %1330 = vmatprep.subr.bf16.mxu0 %v3008_v44 }
  0xb4   : > { %1286 = vmatpush2.bf16.msra.mxu1 %v3021_v60 }
  0xb5   : > { %1287 = vmatprep.subr.bf16.mxu1 %v3029_v63 }
  0xb6   : > { %1331 = vmatpush2.bf16.msra.mxu0 %v3006_v47 }
  0xb7   : > { %1332 = vmatprep.subr.bf16.mxu0 %v3014_v51 }
  0xb8   : > { %1288 = vmatpush2.bf16.msra.mxu1 %v3027_v62 }
  0xb9   : > { %1790 = vmatprep.subr.bf16.mxu1 %v3035_v3 }
  0xba   : > { %1333 = vmatpush2.bf16.msra.mxu0 %v3012_v53 }
  0xbb   : > { %1334 = vmatprep.subr.bf16.mxu0 %v3020_v55 }
  0xbe   : > { %1335 = vmatpush2.bf16.msra.mxu0 %v3018_v57 }
  0xbf   : > { %1336 = vmatprep.subr.bf16.mxu0 %v3026_v59 }
  0xc2   : > { %1337 = vmatpush2.bf16.msra.mxu0 %v3024_v61 }
  0xc3   : > { %1338 = vmatprep.subr.bf16.mxu0 %v3032_v2 }
  0xc6   : > { %1339 = vmatpush2.bf16.msra.mxu0 %v3030_v1 }
  0xc7   : > { %1841 = vmatprep.subr.bf16.mxu0 %v3038_v4 }
 0x129   : > { %v436_v5 = vpop.f32.mrf.mxu0  ;;  %v608_v7 = vpop.f32.mrf.mxu1 }
 0x12a   : > { %v453_v26 = vadd.f32 %v436_v5, %v289_v24 }
 0x12b   : > { %v438_v6 = vpop.f32.mrf.mxu0  ;;  %v610_v9 = vpop.f32.mrf.mxu1 }
 0x12c   : > { %v454_v27 = vadd.f32 %v438_v6, %v293_v25  ;;  %v625_v28 = vadd.f32 %v608_v7, %v453_v26 }
 0x12d   : > { %v440_v8 = vpop.f32.mrf.mxu0  ;;  %v612_v11 = vpop.f32.mrf.mxu1 }
 0x12e   : > { %v455_v29 = vadd.f32 %v440_v8, %v289_v24  ;;  %v626_v32 = vadd.f32 %v610_v9, %v454_v27 }
 0x12f   : > { %v442_v10 = vpop.f32.mrf.mxu0  ;;  %v614_v12 = vpop.f32.mrf.mxu1 }
 0x130   : > { %v456_v30 = vadd.f32 %v442_v10, %v293_v25  ;;  %v627_v35 = vadd.f32 %v612_v11, %v455_v29 }
 0x131   : > { %v446_v13 = vpop.f32.mrf.mxu0  ;;  %v618_v15 = vpop.f32.mrf.mxu1 }
 0x132   : > { %v457_v36 = vadd.f32 %v446_v13, %v289_v24  ;;  %v628_v39 = vadd.f32 %v614_v12, %v456_v30  ;;  %v3033_v12 = vld [vmem:[#allocation5 + $0x2e0] ss:$16 sps:$4 sm:$0xff]   ;;  %v3036_v13 = vld [vmem:[#allocation5 + $0x2e8] ss:$16 sps:$4 sm:$0xff]   ;;  %v3047_v24 = vld [vmem:[#allocation5 + $0x2a4] ss:$16 sps:$4 sm:$0xff]  }
 0x133   : > { %v448_v14 = vpop.f32.mrf.mxu0  ;;  %v620_v16 = vpop.f32.mrf.mxu1 }
 0x134   : > { %v458_v41 = vadd.f32 %v448_v14, %v293_v25  ;;  %v629_v46 = vadd.f32 %v618_v15, %v457_v36  ;;  %v3048_v36 = vld [vmem:[#allocation5 + $0x2a8] ss:$16 sps:$4 sm:$0xff]  }
 0x135   : > { %v450_v0 = vpop.f32.mrf.mxu0  ;;  %v622_v18 = vpop.f32.mrf.mxu1 }
 0x136   : > { %v630_v53 = vadd.f32 %v620_v16, %v458_v41  ;;  %v3041_v0 = vld [vmem:[#allocation5 + $0x2c4] ss:$16 sps:$4 sm:$0xff]   ;;  %v3044_v16 = vld [vmem:[#allocation5 + $0x2cc] ss:$16 sps:$4 sm:$0xff]  }
 0x137   : > { %v451_v17 = vpop.f32.mrf.mxu0  ;;  %v623_v20 = vpop.f32.mrf.mxu1 }
 0x138   : > { %v3039_v20 = vld [vmem:[#allocation5 + $0x2c0] ss:$16 sps:$4 sm:$0xff]  }
 0x149   : > { %v768_v31 = vpop.f32.mrf.mxu0 }
 0x14a   : > { %v785_v33 = vadd.f32 %v768_v31, %v625_v28  ;;  %v3050_v28 = vld [vmem:[#allocation5 + $0x2ac] ss:$16 sps:$4 sm:$0xff]  }
 0x14b   : > { %v770_v34 = vpop.f32.mrf.mxu0 }
 0x14c   : > { %v791_v37 = vmax.f32 %v785_v33, 0.0  ;;  %v786_v38 = vadd.f32 %v770_v34, %v626_v32 }
 0x14d   : > { %v772_v40 = vpop.f32.mrf.mxu0 }
 0x14e   : > { %v804_v42 = vrot.slane %v791_v37, 7  ;;  %v792_v43 = vmax.f32 %v786_v38, 0.0  ;;  %v787_v44 = vadd.f32 %v772_v40, %v627_v35  ;;  %v3045_v35 = vld [vmem:[#allocation5 + $0x2a0] ss:$16 sps:$4 sm:$0xff]   ;;  %v3056_v40 = vld [vmem:[#allocation5 + $0x28c] ss:$16 sps:$4 sm:$0xff]  }
 0x14f   : > { %v774_v45 = vpop.f32.mrf.mxu0 }
 0x150   : > { %820 = vst [vmem:[#allocation2] sm:$0xfe] %v804_v42  ;;  %v805_v47 = vrot.slane %v792_v43, 7  ;;  %v793_v50 = vmax.f32 %v787_v44, 0.0  ;;  %v788_v51 = vadd.f32 %v774_v45, %v628_v39  ;;  %v3053_v39 = vld [vmem:[#allocation5 + $0x284] ss:$16 sps:$4 sm:$0xff]  }
 0x151   : > { %v778_v52 = vpop.f32.mrf.mxu0  ;;  %v3054_v43 = vld [vmem:[#allocation5 + $0x288] ss:$16 sps:$4 sm:$0xff]   ;;  %v3059_v44 = vld [vmem:[#allocation5 + $0x264] ss:$16 sps:$4 sm:$0xff]   ;;  %v3062_v45 = vld [vmem:[#allocation5 + $0x26c] ss:$16 sps:$4 sm:$0xff]  }
 0x152   : > { %821 = vst [vmem:[#allocation2 + $0x8] sm:$0xfe] %v805_v47  ;;  %v806_v54 = vrot.slane %v793_v50, 7  ;;  %v794_v55 = vmax.f32 %v788_v51, 0.0  ;;  %v789_v56 = vadd.f32 %v778_v52, %v629_v46  ;;  %v3057_v46 = vld [vmem:[#allocation5 + $0x260] ss:$16 sps:$4 sm:$0xff]  }
 0x153   : > { %v780_v57 = vpop.f32.mrf.mxu0  ;;  %v3065_v50 = vld [vmem:[#allocation5 + $0x244] ss:$16 sps:$4 sm:$0xff]   ;;  %v3068_v51 = vld [vmem:[#allocation5 + $0x24c] ss:$16 sps:$4 sm:$0xff]   ;;  %v3063_v52 = vld [vmem:[#allocation5 + $0x240] ss:$16 sps:$4 sm:$0xff]  }
 0x154   : > { %v807_v58 = vsel %vm803_vm3, %v804_v42, %v806_v54  ;;  %v808_v59 = vrot.slane %v794_v55, 7  ;;  %v795_v60 = vmax.f32 %v789_v56, 0.0  ;;  %v790_v61 = vadd.f32 %v780_v57, %v630_v53  ;;  %v3051_v42 = vld [vmem:[#allocation5 + $0x280] ss:$16 sps:$4 sm:$0xff]   ;;  %v3066_v53 = vld [vmem:[#allocation5 + $0x248] ss:$16 sps:$4 sm:$0xff]  }
 0x155   : > { %822 = vst [vmem:[#allocation2 + $0x10] sm:$0xff] %v807_v58  ;;  %v782_v62 = vpop.f32.mrf.mxu0  ;;  %v3074_v55 = vld [vmem:[#allocation5 + $0x22c] ss:$16 sps:$4 sm:$0xff]   ;;  %v3069_v56 = vld [vmem:[#allocation5 + $0x220] ss:$16 sps:$4 sm:$0xff]  }
 0x156   : > { %v809_v63 = vsel %vm803_vm3, %v805_v47, %v808_v59  ;;  %v810_v1 = vrot.slane %v795_v60, 7  ;;  %v796_v2 = vmax.f32 %v790_v61, 0.0  ;;  %v3060_v47 = vld [vmem:[#allocation5 + $0x268] ss:$16 sps:$4 sm:$0xff]   ;;  %v3077_v58 = vld [vmem:[#allocation5 + $0x204] ss:$16 sps:$4 sm:$0xff]  }
 0x157   : > { %823 = vst [vmem:[#allocation2 + $0x18] sm:$0xff] %v809_v63  ;;  %v783_v3 = vpop.f32.mrf.mxu0  ;;  %v841_v7 = vld [vmem:[#allocation2] sm:$0xff]  ;;  %v3072_v57 = vld [vmem:[#allocation5 + $0x228] ss:$16 sps:$4 sm:$0xff]   ;;  %v3086_v63 = vld [vmem:[#allocation5 + $0x3ec] ss:$16 sps:$4 sm:$0xff]  }
 0x158   : > { %833 = vst.msk [vmem:[#allocation2 + $0x11] ss:$8 sm:$0x3] %vm3498_vm2, %v3358_v49  ;;  %836 = vst.msk [vmem:[#allocation2 + $0x12] ss:$8 sm:$0x3] %vm3498_vm2, %v3358_v49  ;;  %v811_v4 = vsel %vm803_vm3, %v806_v54, %v810_v1 }
 0x159   : > { %v812_v5 = vrot.slane %v796_v2, 7  ;;  %824 = vst [vmem:[#allocation2 + $0x20] sm:$0x7] %v811_v4  ;;  %v842_v8 = vld [vmem:[#allocation2 + $0x8] sm:$0xff]  ;;  %v3071_v54 = vld [vmem:[#allocation5 + $0x224] ss:$16 sps:$4 sm:$0xff]  }
 0x15a   : > { %v3075_v60 = vld [vmem:[#allocation5 + $0x200] ss:$16 sps:$4 sm:$0xff]   ;;  %v3078_v61 = vld [vmem:[#allocation5 + $0x208] ss:$16 sps:$4 sm:$0xff]   ;;  %v3083_v62 = vld [vmem:[#allocation5 + $0x3e4] ss:$16 sps:$4 sm:$0xff]  }
 0x15b   : > { %v813_v6 = vsel %vm803_vm3, %v808_v59, %v812_v5  ;;  %v3080_v59 = vld [vmem:[#allocation5 + $0x20c] ss:$16 sps:$4 sm:$0xff]   ;;  %v3081_v1 = vld [vmem:[#allocation5 + $0x3e0] ss:$16 sps:$4 sm:$0xff]   ;;  %v3084_v2 = vld [vmem:[#allocation5 + $0x3e8] ss:$16 sps:$4 sm:$0xff]  }
 0x15c   : > { %825 = vst [vmem:[#allocation2 + $0x28] sm:$0x7] %v813_v6  ;;  %v3089_v3 = vld [vmem:[#allocation5 + $0x3c4] ss:$16 sps:$4 sm:$0xff]   ;;  %v3092_v4 = vld [vmem:[#allocation5 + $0x3cc] ss:$16 sps:$4 sm:$0xff]  }
 0x15d   : > { %v3087_v5 = vld [vmem:[#allocation5 + $0x3c0] ss:$16 sps:$4 sm:$0xff]   ;;  %v3090_v6 = vld [vmem:[#allocation5 + $0x3c8] ss:$16 sps:$4 sm:$0xff]  }
 0x15f   : > { %v844_v9 = vld [vmem:[#allocation2 + $0x18] sm:$0xff]  ;;  %v843_v10 = vld [vmem:[#allocation2 + $0x10] sm:$0xff] }
 0x160   : > { %v870_v11 = vpack.c.bf16 %v844_v9, %v842_v8  ;;  %v3526_v14 = vpack.c.bf16 %v843_v10, %v841_v7  ;;  %v845_v15 = vld [vmem:[#allocation2 + $0x20] sm:$0xf]  ;;  %v3095_v7 = vld [vmem:[#allocation5 + $0x3a4] ss:$16 sps:$4 sm:$0xff]   ;;  %v3098_v8 = vld [vmem:[#allocation5 + $0x3ac] ss:$16 sps:$4 sm:$0xff]  }
 0x161   : > { %v3528_v48 = vpack.c.bf16 %v845_v15, %v845_v15  ;;  %v3093_v9 = vld [vmem:[#allocation5 + $0x3a0] ss:$16 sps:$4 sm:$0xff]   ;;  %v3096_v10 = vld [vmem:[#allocation5 + $0x3a8] ss:$16 sps:$4 sm:$0xff]  }
 0x162   : > { %1289 = vmatprep.mubr.bf16.mxu1 %v870_v11  ;;  %1340 = vmatprep.mubr.bf16.mxu0 %v870_v11  ;;  %v1451_v17 = vshll.u32 %v870_v11, 16  ;;  %v1973_v26 = vrot.slane %v3526_v14, 1  ;;  %v1976_v30 = vrot.slane %v870_v11, 1  ;;  %v1449_v32 = vshrl.u32 %v870_v11, 16  ;;  %v3101_v11 = vld [vmem:[#allocation5 + $0x384] ss:$16 sps:$4 sm:$0xff]  }
 0x163   : > { %v846_v49 = vld [vmem:[#allocation2 + $0x28] sm:$0xf]  ;;  %1290 = vmatmul.mubr.bf16.vlgmr.msra.gmra.mxu1 %v3526_v14  ;;  %1341 = vmatmul.mubr.bf16.vlgmr.msra.gmra.mxu0 %v3526_v14  ;;  %v3536_v27 = vrot.slane %v3528_v48, 1 }
 0x164   : > { %v3532_v18 = vpack.c.bf16 %v846_v49, %v846_v49  ;;  %1791 = vmatpush1.bf16.msra.mxu1 %v3033_v12  ;;  %1842 = vmatpush1.bf16.msra.mxu0 %v3036_v13  ;;  %v1453_v25 = vrot.slane %v1451_v17, 1  ;;  %v3104_v12 = vld [vmem:[#allocation5 + $0x38c] ss:$16 sps:$4 sm:$0xff]   ;;  %v3099_v13 = vld [vmem:[#allocation5 + $0x380] ss:$16 sps:$4 sm:$0xff]  }
 0x165   : > { %1792 = vmatprep.subr.bf16.mxu1 %v3041_v0  ;;  %1843 = vmatprep.subr.bf16.mxu0 %v3044_v16  ;;  %v3546_v33 = vsel %vm648_vm1, %v1973_v26, %v3536_v27  ;;  %v3102_v15 = vld [vmem:[#allocation5 + $0x388] ss:$16 sps:$4 sm:$0xff]   ;;  %v3107_v0 = vld [vmem:[#allocation5 + $0x364] ss:$16 sps:$4 sm:$0xff]   ;;  %v3110_v49 = vld [vmem:[#allocation5 + $0x36c] ss:$16 sps:$4 sm:$0xff]  }
 0x166   : > { %1299 = vmatprep.mubr.bf16.mxu1 %v3532_v18  ;;  %1350 = vmatprep.mubr.bf16.mxu0 %v3532_v18  ;;  %v1456_v29 = vshll.u32 %v3532_v18, 16  ;;  %v3542_v31 = vrot.slane %v3532_v18, 1  ;;  %v1454_v37 = vor.u32 %v1453_v25, %v1449_v32  ;;  %v3105_v16 = vld [vmem:[#allocation5 + $0x360] ss:$16 sps:$4 sm:$0xff]   ;;  %v3108_v17 = vld [vmem:[#allocation5 + $0x368] ss:$16 sps:$4 sm:$0xff]  }
 0x167   : > { %v3114_v25 = vld [vmem:[#allocation5 + $0x348] ss:$16 sps:$4 sm:$0xff]   ;;  %v3119_v26 = vld [vmem:[#allocation5 + $0x324] ss:$16 sps:$4 sm:$0xff]  }
 0x168   : > { %v3550_v34 = vsel %vm648_vm1, %v1976_v30, %v3542_v31  ;;  %1793 = vmatpush1.bf16.msra.mxu1 %v3039_v20  ;;  %1844 = vmatpush1.bf16.msra.mxu0 %v3042_v22  ;;  %v3552_v38 = vrot.slane %v1456_v29, 1  ;;  %v3113_v20 = vld [vmem:[#allocation5 + $0x344] ss:$16 sps:$4 sm:$0xff]   ;;  %v3116_v22 = vld [vmem:[#allocation5 + $0x34c] ss:$16 sps:$4 sm:$0xff]   ;;  %v1439_v29 = vshll.u32 %v3526_v14, 16 }
 0x169   : > { %1794 = vmatprep.subr.bf16.mxu1 %v3047_v24  ;;  %1845 = vmatprep.subr.bf16.mxu0 %v3050_v28  ;;  %v3111_v24 = vld [vmem:[#allocation5 + $0x340] ss:$16 sps:$4 sm:$0xff]   ;;  %v3122_v28 = vld [vmem:[#allocation5 + $0x32c] ss:$16 sps:$4 sm:$0xff]   ;;  %v3120_v32 = vld [vmem:[#allocation5 + $0x328] ss:$16 sps:$4 sm:$0xff]  }
 0x16a   : > { %v1459_v41 = vsel %vm476_vm0, %v1454_v37, %v3552_v38  ;;  %v3117_v30 = vld [vmem:[#allocation5 + $0x320] ss:$16 sps:$4 sm:$0xff]   ;;  %v1441_v37 = vrot.slane %v1439_v29, 1  ;;  %v3194_v29 = vld [vmem:[#allocation5 + $0x5ac] ss:$16 sps:$4 sm:$0xff]  }
 0x16b   : > { %1300 = vmatmul.mubr.bf16.gmra.mxu1 %v3528_v48  ;;  %1351 = vmatmul.mubr.bf16.gmra.mxu0 %v3528_v48 }
 0x16c   : > { %1795 = vmatpush1.bf16.msra.mxu1 %v3045_v35  ;;  %1846 = vmatpush1.bf16.msra.mxu0 %v3048_v36  ;;  %v3125_v35 = vld [vmem:[#allocation5 + $0x304] ss:$16 sps:$4 sm:$0xff]   ;;  %v3128_v36 = vld [vmem:[#allocation5 + $0x30c] ss:$16 sps:$4 sm:$0xff]  }
 0x16d   : > { %1822 = vmatprep.mubr.bf16.mxu1 %v1459_v41  ;;  %1873 = vmatprep.mubr.bf16.mxu0 %v1459_v41  ;;  %v3126_v41 = vld [vmem:[#allocation5 + $0x308] ss:$16 sps:$4 sm:$0xff]  }
 0x16e   : > { %1796 = vmatprep.subr.bf16.mxu1 %v3053_v39  ;;  %1847 = vmatprep.subr.bf16.mxu0 %v3056_v40  ;;  %v1444_v39 = vshll.u32 %v3528_v48, 16  ;;  %v3123_v40 = vld [vmem:[#allocation5 + $0x300] ss:$16 sps:$4 sm:$0xff]  }
 0x170   : > { %1797 = vmatpush1.bf16.msra.mxu1 %v3051_v42  ;;  %1848 = vmatpush1.bf16.msra.mxu0 %v3054_v43  ;;  %v1437_v42 = vshrl.u32 %v3526_v14, 16  ;;  %v3131_v43 = vld [vmem:[#allocation5 + $0x4e4] ss:$16 sps:$4 sm:$0xff]   ;;  %v3140_v14 = vld [vmem:[#allocation5 + $0x4cc] ss:$16 sps:$4 sm:$0xff]  }
 0x171   : > { %1798 = vmatprep.subr.bf16.mxu1 %v3059_v44  ;;  %1849 = vmatprep.subr.bf16.mxu0 %v3062_v45  ;;  %v3134_v44 = vld [vmem:[#allocation5 + $0x4ec] ss:$16 sps:$4 sm:$0xff]  }
 0x172   : > { %v1442_v45 = vor.u32 %v1441_v37, %v1437_v42  ;;  %v3195_v37 = vld [vmem:[#allocation5 + $0x580] ss:$16 sps:$4 sm:$0xff]  }
 0x173   : > { %v3201_v42 = vld [vmem:[#allocation5 + $0x560] ss:$16 sps:$4 sm:$0xff]  }
 0x174   : > { %1799 = vmatpush1.bf16.msra.mxu1 %v3057_v46  ;;  %1850 = vmatpush1.bf16.msra.mxu0 %v3060_v47  ;;  %v1446_v46 = vrot.slane %v1444_v39, 1  ;;  %v1463_v47 = vshrl.u32 %v3532_v18, 16  ;;  %v3143_v18 = vld [vmem:[#allocation5 + $0x4a4] ss:$16 sps:$4 sm:$0xff]   ;;  %v3198_v39 = vld [vmem:[#allocation5 + $0x588] ss:$16 sps:$4 sm:$0xff]  }
 0x175   : > { %1800 = vmatprep.subr.bf16.mxu1 %v3065_v50  ;;  %1851 = vmatprep.subr.bf16.mxu0 %v3068_v51  ;;  %v3129_v50 = vld [vmem:[#allocation5 + $0x4e0] ss:$16 sps:$4 sm:$0xff]   ;;  %v3132_v51 = vld [vmem:[#allocation5 + $0x4e8] ss:$16 sps:$4 sm:$0xff]  }
 0x178   : > { %1801 = vmatpush1.bf16.msra.mxu1 %v3063_v52  ;;  %1852 = vmatpush1.bf16.msra.mxu0 %v3066_v53  ;;  %v1447_v52 = vsel %vm476_vm0, %v1442_v45, %v1446_v46  ;;  %v1465_v53 = vor.u32 %v1463_v47, %v3552_v38  ;;  %v3141_v38 = vld [vmem:[#allocation5 + $0x4a0] ss:$16 sps:$4 sm:$0xff]   ;;  %v3212_v45 = vld [vmem:[#allocation5 + $0x54c] ss:$16 sps:$4 sm:$0xff]   ;;  %v3210_v47 = vld [vmem:[#allocation5 + $0x548] ss:$16 sps:$4 sm:$0xff]  }
 0x179   : > { %1802 = vmatprep.subr.bf16.mxu1 %v3071_v54  ;;  %1853 = vmatprep.subr.bf16.mxu0 %v3074_v55  ;;  %v3137_v54 = vld [vmem:[#allocation5 + $0x4c4] ss:$16 sps:$4 sm:$0xff]   ;;  %v3135_v55 = vld [vmem:[#allocation5 + $0x4c0] ss:$16 sps:$4 sm:$0xff]  }
 0x17c   : > { %1803 = vmatpush1.bf16.msra.mxu1 %v3069_v56  ;;  %1854 = vmatpush1.bf16.msra.mxu0 %v3072_v57  ;;  %v3138_v56 = vld [vmem:[#allocation5 + $0x4c8] ss:$16 sps:$4 sm:$0xff]   ;;  %v3146_v57 = vld [vmem:[#allocation5 + $0x4ac] ss:$16 sps:$4 sm:$0xff]  }
 0x17d   : > { %1804 = vmatprep.subr.bf16.mxu1 %v3077_v58  ;;  %1855 = vmatprep.subr.bf16.mxu0 %v3080_v59  ;;  %v1460_v58 = vshrl.u32 %v3528_v48, 16  ;;  %v3155_v48 = vld [vmem:[#allocation5 + $0x464] ss:$16 sps:$4 sm:$0xff]  }
 0x17f   : > { %v1462_v59 = vor.u32 %v1460_v58, %v1446_v46  ;;  %v3207_v46 = vld [vmem:[#allocation5 + $0x540] ss:$16 sps:$4 sm:$0xff]  }
 0x180   : > { %1805 = vmatpush1.bf16.msra.mxu1 %v3075_v60  ;;  %1856 = vmatpush1.bf16.msra.mxu0 %v3078_v61  ;;  %v3144_v60 = vld [vmem:[#allocation5 + $0x4a8] ss:$16 sps:$4 sm:$0xff]   ;;  %v3149_v61 = vld [vmem:[#allocation5 + $0x484] ss:$16 sps:$4 sm:$0xff]  }
 0x181   : > { %1806 = vmatprep.subr.bf16.mxu1 %v3083_v62  ;;  %1857 = vmatprep.subr.bf16.mxu0 %v3086_v63  ;;  %v3152_v62 = vld [vmem:[#allocation5 + $0x48c] ss:$16 sps:$4 sm:$0xff]   ;;  %v3147_v63 = vld [vmem:[#allocation5 + $0x480] ss:$16 sps:$4 sm:$0xff]  }
 0x184   : > { %1807 = vmatpush2.bf16.msra.mxu1 %v3081_v1  ;;  %1858 = vmatpush2.bf16.msra.mxu0 %v3084_v2  ;;  %v3150_v1 = vld [vmem:[#allocation5 + $0x488] ss:$16 sps:$4 sm:$0xff]   ;;  %v3158_v2 = vld [vmem:[#allocation5 + $0x46c] ss:$16 sps:$4 sm:$0xff]  }
 0x185   : > { %1808 = vmatprep.subr.bf16.mxu1 %v3089_v3  ;;  %1859 = vmatprep.subr.bf16.mxu0 %v3092_v4  ;;  %v3153_v3 = vld [vmem:[#allocation5 + $0x460] ss:$16 sps:$4 sm:$0xff]   ;;  %v3156_v4 = vld [vmem:[#allocation5 + $0x468] ss:$16 sps:$4 sm:$0xff]  }
 0x188   : > { %1809 = vmatpush2.bf16.msra.mxu1 %v3087_v5  ;;  %1860 = vmatpush2.bf16.msra.mxu0 %v3090_v6  ;;  %v3161_v5 = vld [vmem:[#allocation5 + $0x444] ss:$16 sps:$4 sm:$0xff]   ;;  %v3164_v6 = vld [vmem:[#allocation5 + $0x44c] ss:$16 sps:$4 sm:$0xff]  }
 0x189   : > { %1810 = vmatprep.subr.bf16.mxu1 %v3095_v7  ;;  %1861 = vmatprep.subr.bf16.mxu0 %v3098_v8  ;;  %v3159_v7 = vld [vmem:[#allocation5 + $0x440] ss:$16 sps:$4 sm:$0xff]   ;;  %v3167_v8 = vld [vmem:[#allocation5 + $0x424] ss:$16 sps:$4 sm:$0xff]  }
 0x18c   : > { %1811 = vmatpush2.bf16.msra.mxu1 %v3093_v9  ;;  %1862 = vmatpush2.bf16.msra.mxu0 %v3096_v10  ;;  %v3170_v9 = vld [vmem:[#allocation5 + $0x42c] ss:$16 sps:$4 sm:$0xff]   ;;  %v3165_v10 = vld [vmem:[#allocation5 + $0x420] ss:$16 sps:$4 sm:$0xff]  }
 0x18d   : > { %1812 = vmatprep.subr.bf16.mxu1 %v3101_v11  ;;  %1863 = vmatprep.subr.bf16.mxu0 %v3104_v12  ;;  %v3168_v11 = vld [vmem:[#allocation5 + $0x428] ss:$16 sps:$4 sm:$0xff]   ;;  %v3173_v12 = vld [vmem:[#allocation5 + $0x404] ss:$16 sps:$4 sm:$0xff]  }
 0x190   : > { %1813 = vmatpush2.bf16.msra.mxu1 %v3099_v13  ;;  %1864 = vmatpush2.bf16.msra.mxu0 %v3102_v15  ;;  %v3176_v13 = vld [vmem:[#allocation5 + $0x40c] ss:$16 sps:$4 sm:$0xff]   ;;  %v3171_v15 = vld [vmem:[#allocation5 + $0x400] ss:$16 sps:$4 sm:$0xff]  }
 0x191   : > { %1814 = vmatprep.subr.bf16.mxu1 %v3107_v0  ;;  %1865 = vmatprep.subr.bf16.mxu0 %v3110_v49  ;;  %v3174_v0 = vld [vmem:[#allocation5 + $0x408] ss:$16 sps:$4 sm:$0xff]   ;;  %v3179_v49 = vld [vmem:[#allocation5 + $0x5e4] ss:$16 sps:$4 sm:$0xff]  }
 0x194   : > { %1815 = vmatpush2.bf16.msra.mxu1 %v3105_v16  ;;  %1866 = vmatpush2.bf16.msra.mxu0 %v3108_v17  ;;  %v3182_v16 = vld [vmem:[#allocation5 + $0x5ec] ss:$16 sps:$4 sm:$0xff]   ;;  %v3177_v17 = vld [vmem:[#allocation5 + $0x5e0] ss:$16 sps:$4 sm:$0xff]  }
 0x195   : > { %1816 = vmatprep.subr.bf16.mxu1 %v3113_v20  ;;  %1867 = vmatprep.subr.bf16.mxu0 %v3116_v22  ;;  %v3180_v20 = vld [vmem:[#allocation5 + $0x5e8] ss:$16 sps:$4 sm:$0xff]   ;;  %v3185_v22 = vld [vmem:[#allocation5 + $0x5c4] ss:$16 sps:$4 sm:$0xff]  }
 0x198   : > { %1817 = vmatpush2.bf16.msra.mxu1 %v3111_v24  ;;  %1868 = vmatpush2.bf16.msra.mxu0 %v3114_v25  ;;  %v3188_v24 = vld [vmem:[#allocation5 + $0x5cc] ss:$16 sps:$4 sm:$0xff]   ;;  %v3183_v25 = vld [vmem:[#allocation5 + $0x5c0] ss:$16 sps:$4 sm:$0xff]  }
 0x199   : > { %1818 = vmatprep.subr.bf16.mxu1 %v3119_v26  ;;  %1869 = vmatprep.subr.bf16.mxu0 %v3122_v28  ;;  %v3186_v26 = vld [vmem:[#allocation5 + $0x5c8] ss:$16 sps:$4 sm:$0xff]   ;;  %v3191_v28 = vld [vmem:[#allocation5 + $0x5a4] ss:$16 sps:$4 sm:$0xff]  }
 0x19c   : > { %1819 = vmatpush2.bf16.msra.mxu1 %v3117_v30  ;;  %1870 = vmatpush2.bf16.msra.mxu0 %v3120_v32  ;;  %v3189_v30 = vld [vmem:[#allocation5 + $0x5a0] ss:$16 sps:$4 sm:$0xff]   ;;  %v3192_v32 = vld [vmem:[#allocation5 + $0x5a8] ss:$16 sps:$4 sm:$0xff]  }
 0x19d   : > { %1820 = vmatprep.subr.bf16.mxu1 %v3125_v35  ;;  %1871 = vmatprep.subr.bf16.mxu0 %v3128_v36  ;;  %v3197_v35 = vld [vmem:[#allocation5 + $0x584] ss:$16 sps:$4 sm:$0xff]   ;;  %v3200_v36 = vld [vmem:[#allocation5 + $0x58c] ss:$16 sps:$4 sm:$0xff]  }
 0x1a0   : > { %1821 = vmatpush2.bf16.msra.mxu1 %v3123_v40  ;;  %1872 = vmatpush2.bf16.msra.mxu0 %v3126_v41  ;;  %v3203_v40 = vld [vmem:[#allocation5 + $0x564] ss:$16 sps:$4 sm:$0xff]   ;;  %v3206_v41 = vld [vmem:[#allocation5 + $0x56c] ss:$16 sps:$4 sm:$0xff]  }
 0x1a1   : > { %2303 = vmatprep.subr.bf16.mxu1 %v3131_v43  ;;  %2354 = vmatprep.subr.bf16.mxu0 %v3134_v44  ;;  %v3204_v43 = vld [vmem:[#allocation5 + $0x568] ss:$16 sps:$4 sm:$0xff]   ;;  %v3209_v44 = vld [vmem:[#allocation5 + $0x544] ss:$16 sps:$4 sm:$0xff]  }
 0x1a3   : > { %1823 = vmatmul.mubr.bf16.vlgmr.msra.gmra.mxu1 %v1447_v52  ;;  %1874 = vmatmul.mubr.bf16.vlgmr.msra.gmra.mxu0 %v1447_v52  ;;  %v3213_v52 = vld [vmem:[#allocation5 + $0x520] ss:$16 sps:$4 sm:$0xff]  }
 0x1a4   : > { %1832 = vmatprep.mubr.bf16.mxu1 %v1465_v53  ;;  %1883 = vmatprep.mubr.bf16.mxu0 %v1465_v53  ;;  %v3216_v53 = vld [vmem:[#allocation5 + $0x528] ss:$16 sps:$4 sm:$0xff]  }
 0x1a5   : > { %2304 = vmatpush1.bf16.msra.mxu1 %v3129_v50  ;;  %2355 = vmatpush1.bf16.msra.mxu0 %v3132_v51  ;;  %v3215_v50 = vld [vmem:[#allocation5 + $0x524] ss:$16 sps:$4 sm:$0xff]   ;;  %v3218_v51 = vld [vmem:[#allocation5 + $0x52c] ss:$16 sps:$4 sm:$0xff]  }
 0x1a6   : > { %2305 = vmatprep.subr.bf16.mxu1 %v3137_v54  ;;  %2356 = vmatprep.subr.bf16.mxu0 %v3140_v14  ;;  %v3221_v54 = vld [vmem:[#allocation5 + $0x504] ss:$16 sps:$4 sm:$0xff]   ;;  %v3224_v14 = vld [vmem:[#allocation5 + $0x50c] ss:$16 sps:$4 sm:$0xff]  }
 0x1a9   : > { %2306 = vmatpush1.bf16.msra.mxu1 %v3135_v55  ;;  %2357 = vmatpush1.bf16.msra.mxu0 %v3138_v56  ;;  %v3219_v55 = vld [vmem:[#allocation5 + $0x500] ss:$16 sps:$4 sm:$0xff]   ;;  %v3222_v56 = vld [vmem:[#allocation5 + $0x508] ss:$16 sps:$4 sm:$0xff]  }
 0x1aa   : > { %2307 = vmatprep.subr.bf16.mxu1 %v3143_v18  ;;  %2358 = vmatprep.subr.bf16.mxu0 %v3146_v57 }
 0x1ab   : > { %1833 = vmatmul.mubr.bf16.gmra.mxu1 %v1462_v59  ;;  %1884 = vmatmul.mubr.bf16.gmra.mxu0 %v1462_v59 }
 0x1ac   : > { %2335 = vmatprep.mubr.bf16.mxu1 %v3550_v34  ;;  %2386 = vmatprep.mubr.bf16.mxu0 %v3550_v34  ;;  %v3162_v34 = vld [vmem:[#allocation5 + $0x448] ss:$16 sps:$4 sm:$0xff]  }
 0x1ad   : > { %2308 = vmatpush1.bf16.msra.mxu1 %v3141_v38  ;;  %2359 = vmatpush1.bf16.msra.mxu0 %v3144_v60 }
 0x1ae   : > { %2309 = vmatprep.subr.bf16.mxu1 %v3149_v61  ;;  %2360 = vmatprep.subr.bf16.mxu0 %v3152_v62 }
 0x1b1   : > { %2310 = vmatpush1.bf16.msra.mxu1 %v3147_v63  ;;  %2361 = vmatpush1.bf16.msra.mxu0 %v3150_v1 }
 0x1b2   : > { %2311 = vmatprep.subr.bf16.mxu1 %v3155_v48  ;;  %2362 = vmatprep.subr.bf16.mxu0 %v3158_v2 }
 0x1b5   : > { %2312 = vmatpush1.bf16.msra.mxu1 %v3153_v3  ;;  %2363 = vmatpush1.bf16.msra.mxu0 %v3156_v4 }
 0x1b6   : > { %2313 = vmatprep.subr.bf16.mxu1 %v3161_v5  ;;  %2364 = vmatprep.subr.bf16.mxu0 %v3164_v6  ;;  %v847_v5 = vld [vmem:[#allocation8] sm:$0xf]  ;;  %v863_v6 = vsub.s32 3, %v3508_v19 }
 0x1b9   : > { %2314 = vmatpush1.bf16.msra.mxu1 %v3159_v7  ;;  %2365 = vmatpush1.bf16.msra.mxu0 %v3162_v34 }
 0x1ba   : > { %2315 = vmatprep.subr.bf16.mxu1 %v3167_v8  ;;  %2366 = vmatprep.subr.bf16.mxu0 %v3170_v9  ;;  %v852_v8 = vrot.slane %v847_v5, %v288_v21 }
 0x1bd   : > { %2316 = vmatpush1.bf16.msra.mxu1 %v3165_v10  ;;  %2367 = vmatpush1.bf16.msra.mxu0 %v3168_v11 }
 0x1be   : > { %2317 = vmatprep.subr.bf16.mxu1 %v3173_v12  ;;  %2368 = vmatprep.subr.bf16.mxu0 %v3176_v13  ;;  %v856_v12 = vrot.slane %v847_v5, %v292_v23  ;;  %v864_v13 = vrot.slane %v847_v5, %v863_v6 }
 0x1c1   : > { %2318 = vmatpush1.bf16.msra.mxu1 %v3171_v15  ;;  %2369 = vmatpush1.bf16.msra.mxu0 %v3174_v0 }
 0x1c2   : > { %2319 = vmatprep.subr.bf16.mxu1 %v3179_v49  ;;  %2370 = vmatprep.subr.bf16.mxu0 %v3182_v16 }
 0x1c5   : > { %2320 = vmatpush2.bf16.msra.mxu1 %v3177_v17  ;;  %2371 = vmatpush2.bf16.msra.mxu0 %v3180_v20 }
 0x1c6   : > { %2321 = vmatprep.subr.bf16.mxu1 %v3185_v22  ;;  %2372 = vmatprep.subr.bf16.mxu0 %v3188_v24 }
 0x1c9   : > { %2322 = vmatpush2.bf16.msra.mxu1 %v3183_v25  ;;  %2373 = vmatpush2.bf16.msra.mxu0 %v3186_v26 }
 0x1ca   : > { %2323 = vmatprep.subr.bf16.mxu1 %v3191_v28  ;;  %2374 = vmatprep.subr.bf16.mxu0 %v3194_v29 }
 0x1cd   : > { %2324 = vmatpush2.bf16.msra.mxu1 %v3189_v30  ;;  %2375 = vmatpush2.bf16.msra.mxu0 %v3192_v32 }
 0x1ce   : > { %2325 = vmatprep.subr.bf16.mxu1 %v3197_v35  ;;  %2376 = vmatprep.subr.bf16.mxu0 %v3200_v36 }
 0x1d1   : > { %2326 = vmatpush2.bf16.msra.mxu1 %v3195_v37  ;;  %2377 = vmatpush2.bf16.msra.mxu0 %v3198_v39 }
 0x1d2   : > { %2327 = vmatprep.subr.bf16.mxu1 %v3203_v40  ;;  %2378 = vmatprep.subr.bf16.mxu0 %v3206_v41 }
 0x1d5   : > { %2328 = vmatpush2.bf16.msra.mxu1 %v3201_v42  ;;  %2379 = vmatpush2.bf16.msra.mxu0 %v3204_v43 }
 0x1d6   : > { %2329 = vmatprep.subr.bf16.mxu1 %v3209_v44  ;;  %2380 = vmatprep.subr.bf16.mxu0 %v3212_v45 }
 0x1d9   : > { %2330 = vmatpush2.bf16.msra.mxu1 %v3207_v46  ;;  %2381 = vmatpush2.bf16.msra.mxu0 %v3210_v47 }
 0x1da   : > { %2331 = vmatprep.subr.bf16.mxu1 %v3215_v50  ;;  %2382 = vmatprep.subr.bf16.mxu0 %v3218_v51 }
 0x1dd   : > { %2332 = vmatpush2.bf16.msra.mxu1 %v3213_v52  ;;  %2383 = vmatpush2.bf16.msra.mxu0 %v3216_v53 }
 0x1de   : > { %2333 = vmatprep.subr.bf16.mxu1 %v3221_v54  ;;  %2384 = vmatprep.subr.bf16.mxu0 %v3224_v14 }
 0x1e1   : > { %2334 = vmatpush2.bf16.msra.mxu1 %v3219_v55  ;;  %2385 = vmatpush2.bf16.msra.mxu0 %v3222_v56 }
 0x1e4   : > { %2336 = vmatmul.mubr.bf16.vlgmr.msra.gmra.mxu1 %v3546_v33  ;;  %2387 = vmatmul.mubr.bf16.vlgmr.msra.gmra.mxu0 %v3546_v33 }
 0x1e5   : > { %2345 = vmatprep.mubr.bf16.mxu1 %v3542_v31  ;;  %2396 = vmatprep.mubr.bf16.mxu0 %v3542_v31 }
 0x1ec   : > { %2346 = vmatmul.mubr.bf16.gmra.mxu1 %v3536_v27  ;;  %2397 = vmatmul.mubr.bf16.gmra.mxu0 %v3536_v27  ;;  %v859_v27 = vsub.s32 2, %v3508_v19 }
 0x1ee   : > { %v860_v9 = vrot.slane %v847_v5, %v859_v27 }
 0x223   : > { %v1291_v18 = vpop.f32.mrf.mxu1  ;;  %v1342_v57 = vpop.f32.mrf.mxu0 }
 0x224   : > { %v1359_v39 = vadd.f32 %v1291_v18, %v852_v8  ;;  %v1361_v40 = vadd.f32 %v1342_v57, %v860_v9 }
 0x225   : > { %v1293_v58 = vpop.f32.mrf.mxu1  ;;  %v1344_v59 = vpop.f32.mrf.mxu0 }
 0x226   : > { %v1360_v41 = vadd.f32 %v1293_v58, %v856_v12  ;;  %v1362_v42 = vadd.f32 %v1344_v59, %v864_v13 }
 0x227   : > { %v1295_v38 = vpop.f32.mrf.mxu1  ;;  %v1346_v60 = vpop.f32.mrf.mxu0 }
 0x228   : > { %v1363_v15 = vadd.f32 %v1295_v38, %v852_v8  ;;  %v1365_v0 = vadd.f32 %v1346_v60, %v860_v9 }
 0x229   : > { %v1297_v61 = vpop.f32.mrf.mxu1  ;;  %v1348_v62 = vpop.f32.mrf.mxu0 }
 0x22a   : > { %v1364_v17 = vadd.f32 %v1297_v61, %v856_v12  ;;  %v1366_v20 = vadd.f32 %v1348_v62, %v864_v13 }
 0x22b   : > { %v1301_v63 = vpop.f32.mrf.mxu1  ;;  %v1352_v1 = vpop.f32.mrf.mxu0 }
 0x22c   : > { %v1367_v57 = vadd.f32 %v1301_v63, %v852_v8  ;;  %v1369_v58 = vadd.f32 %v1352_v1, %v860_v9 }
 0x22d   : > { %v3573_v48 = vpop.f32.mrf.mxu1  ;;  %v3575_v33 = vpop.f32.mrf.mxu0 }
 0x22e   : > { %v1368_v62 = vadd.f32 %v3573_v48, %v856_v12 }
 0x22f   : > { %v1305_v2 = vpop.f32.mrf.mxu1  ;;  %v1356_v31 = vpop.f32.mrf.mxu0 }
 0x230   : > { %v1370_v2 = vadd.f32 %v3575_v33, %v864_v13 }
 0x231   : > { %v1306_v3 = vpop.f32.mrf.mxu1  ;;  %v1357_v4 = vpop.f32.mrf.mxu0 }
 0x263   : > { %v1824_v7 = vpop.f32.mrf.mxu1  ;;  %v1875_v34 = vpop.f32.mrf.mxu0 }
 0x264   : > { %v1892_v43 = vadd.f32 %v1824_v7, %v1359_v39  ;;  %v1894_v44 = vadd.f32 %v1875_v34, %v1361_v40 }
 0x265   : > { %v1826_v10 = vpop.f32.mrf.mxu1  ;;  %v1877_v11 = vpop.f32.mrf.mxu0 }
 0x266   : > { %v1893_v47 = vadd.f32 %v1826_v10, %v1360_v41  ;;  %v1895_v50 = vadd.f32 %v1877_v11, %v1362_v42 }
 0x267   : > { %v1828_v49 = vpop.f32.mrf.mxu1  ;;  %v1879_v16 = vpop.f32.mrf.mxu0 }
 0x268   : > { %v1896_v22 = vadd.f32 %v1828_v49, %v1363_v15  ;;  %v1898_v24 = vadd.f32 %v1879_v16, %v1365_v0 }
 0x269   : > { %v1830_v25 = vpop.f32.mrf.mxu1  ;;  %v1881_v26 = vpop.f32.mrf.mxu0 }
 0x26a   : > { %v1897_v28 = vadd.f32 %v1830_v25, %v1364_v17  ;;  %v1899_v21 = vadd.f32 %v1881_v26, %v1366_v20 }
 0x26b   : > { %v1834_v29 = vpop.f32.mrf.mxu1  ;;  %v1885_v30 = vpop.f32.mrf.mxu0 }
 0x26c   : > { %v1900_v31 = vadd.f32 %v1834_v29, %v1367_v57  ;;  %v1902_v3 = vadd.f32 %v1885_v30, %v1369_v58 }
 0x26d   : > { %v1836_v32 = vpop.f32.mrf.mxu1  ;;  %v1887_v35 = vpop.f32.mrf.mxu0 }
 0x26e   : > { %v1901_v7 = vadd.f32 %v1836_v32, %v1368_v62  ;;  %v1903_v34 = vadd.f32 %v1887_v35, %v1370_v2 }
 0x26f   : > { %v1838_v19 = vpop.f32.mrf.mxu1  ;;  %v1889_v23 = vpop.f32.mrf.mxu0 }
 0x271   : > { %v1839_v36 = vpop.f32.mrf.mxu1  ;;  %v1890_v37 = vpop.f32.mrf.mxu0 }
 0x2a4   : > { %v2337_v45 = vpop.f32.mrf.mxu1  ;;  %v2388_v46 = vpop.f32.mrf.mxu0 }
 0x2a5   : > { %v2405_v51 = vadd.f32 %v2337_v45, %v1892_v43  ;;  %v2407_v52 = vadd.f32 %v2388_v46, %v1894_v44 }
 0x2a6   : > { %v2339_v53 = vpop.f32.mrf.mxu1  ;;  %v2390_v54 = vpop.f32.mrf.mxu0 }
 0x2a7   : > { %2442 = vst [vmem:[%s3587_s30] sm:$0xff] %v2405_v51  ;;  %2444 = vst [vmem:[%s3587_s30 + $0x10] sm:$0xff] %v2407_v52  ;;  %v2406_v14 = vadd.f32 %v2339_v53, %v1893_v47  ;;  %v2408_v55 = vadd.f32 %v2390_v54, %v1895_v50 }
 0x2a8   : > { %v2341_v56 = vpop.f32.mrf.mxu1  ;;  %v2392_v18 = vpop.f32.mrf.mxu0 }
 0x2a9   : > { %2443 = vst [vmem:[%s3587_s30 + $0x8] sm:$0xff] %v2406_v14  ;;  %2445 = vst [vmem:[%s3587_s30 + $0x18] sm:$0xff] %v2408_v55  ;;  %v2409_v59 = vadd.f32 %v2341_v56, %v1896_v22  ;;  %v2411_v38 = vadd.f32 %v2392_v18, %v1898_v24 }
 0x2aa   : > { %v2343_v60 = vpop.f32.mrf.mxu1  ;;  %v2394_v61 = vpop.f32.mrf.mxu0 }
 0x2ab   : > { %v2410_v4 = vadd.f32 %v2343_v60, %v1897_v28  ;;  %v2412_v27 = vadd.f32 %v2394_v61, %v1899_v21  ;;  %v2426_v8 = vrot.slane %v2409_v59, 2  ;;  %v2432_v9 = vrot.slane %v2411_v38, 2 }
 0x2ac   : > { %v2347_v5 = vpop.f32.mrf.mxu1  ;;  %v2398_v6 = vpop.f32.mrf.mxu0 }
 0x2ad   : > { %v2413_v63 = vadd.f32 %v2347_v5, %v1900_v31  ;;  %v2415_v1 = vadd.f32 %v2398_v6, %v1902_v3  ;;  %v2429_v15 = vrot.slane %v2410_v4, 2  ;;  %v2435_v0 = vrot.slane %v2412_v27, 2 }
 0x2ae   : > { %v2349_v10 = vpop.f32.mrf.mxu1  ;;  %v2400_v11 = vpop.f32.mrf.mxu0 }
 0x2af   : > { %v2427_v48 = vrot.slane %v2413_v63, 2  ;;  %v2433_v12 = vrot.slane %v2415_v1, 2  ;;  %v2414_v33 = vadd.f32 %v2349_v10, %v1901_v7  ;;  %v2416_v13 = vadd.f32 %v2400_v11, %v1903_v34 }
 0x2b0   : > { %v2351_v49 = vpop.f32.mrf.mxu1  ;;  %v2402_v16 = vpop.f32.mrf.mxu0 }
 0x2b1   : > { %v2428_v17 = vsel %vm2425_vm4, %v2426_v8, %v2427_v48  ;;  %v2434_v20 = vsel %vm2425_vm4, %v2432_v9, %v2433_v12  ;;  %v2430_v22 = vrot.slane %v2414_v33, 2  ;;  %v2436_v24 = vrot.slane %v2416_v13, 2 }
 0x2b2   : > { %2446 = vst [vmem:[%s3587_s30 + $0x20] sm:$0xff] %v2428_v17  ;;  %2448 = vst [vmem:[%s3587_s30 + $0x30] sm:$0xff] %v2434_v20  ;;  %v2352_v25 = vpop.f32.mrf.mxu1  ;;  %v2403_v26 = vpop.f32.mrf.mxu0 }
 0x2b3   : > { %v2431_v28 = vsel %vm2425_vm4, %v2429_v15, %v2430_v22  ;;  %v2437_v21 = vsel %vm2425_vm4, %v2435_v0, %v2436_v24 }
 0x2b4   : > { %2447 = vst [vmem:[%s3587_s30 + $0x28] sm:$0xff] %v2431_v28  ;;  %2449 = vst [vmem:[%s3587_s30 + $0x38] sm:$0xff] %v2437_v21 }
 0x2b5 PF: > { %s18_s18 = sadd.s32 1, %s3347_s18  }
 0x2b6   : > { %p15_p7 = scmp.ge.s32.totalorder %s18_s18, 4  }
 0x2b8   :  { %17 = sbr.rel (!%p15_p7) target bundleno = 3 (0x3), region = 94 }
 0x2bd   :  { %2471 = vsyncpa [#allocation4], 1 }
 0x2be   :  { %2473 = vsyncpa [#allocation4 + $0x1], 1 }
 0x2bf   :  { %2474 = vsyncpa [#allocation6], 1 }
 0x2c0   :  { %2475 = vsyncpa [#allocation9], 1 }

</bundles_post_ra>
